<compile_context>
chip_gen: v5e
topology: v5e:2x2
jax: 0.10.0
libtpu: 0.0.40
codegen_flags: <defaults>
</compile_context>

<pallas_src>
import functools

import jax
import jax.numpy as jnp
from jax.experimental import pallas as pl
from jax.experimental.pallas import tpu as pltpu

MXU_DTYPE = jnp.bfloat16   # matmul operand dtype (accumulation stays f32)
LANE = 128                 # vreg / MXU lane width


def _round_up(v, m):
    return (v + m - 1) // m * m


def _resblock_kernel(x_ref, xtop_ref, xbot_ref, w1_ref, b1_ref, w2_ref, b2_ref,
                     out_ref, pad_ref, col_ref, *, TH, W, Cin, mxu_dtype):
    # x_ref   : (1, TH, W, Cin)  f32   tile rows (pre-ReLU; also the residual)
    # xtop_ref: (1, 1,  W, Cin)  f32   row above the tile (valid unless first tile)
    # xbot_ref: (1, 1,  W, Cin)  f32   row below the tile (valid unless last tile)
    # w1_ref  : (9*Cin, Cout_p)  bf16  3x3 weights, (ky,kx,cin)-major rows, lane-padded
    # b1_ref  : (1, Cout_p)      f32
    # w2_ref  : (Cout_p, Cin_p)  bf16  1x1 weights, lane-padded
    # b2_ref  : (1, Cin_p)       f32
    # out_ref : (1, TH, W, Cin)
    # pad_ref : (TH+2, W+2, Cin) f32   zero-padded ReLU(x) with 1-px halo
    # col_ref : (TH, W, 9*Cin)   bf16  im2col patches
    hi = pl.program_id(1)
    nh = pl.num_programs(1)
    x = x_ref[0]                                                   # (TH, W, Cin) f32

    # ---- halo columns (left/right) are always zero ----
    pad_ref[:, 0:1, :] = jnp.zeros((TH + 2, 1, Cin), jnp.float32)
    pad_ref[:, W + 1:W + 2, :] = jnp.zeros((TH + 2, 1, Cin), jnp.float32)
    # ---- fused ReLU while writing the padded interior ----
    pad_ref[1:TH + 1, 1:W + 1, :] = jnp.maximum(x, 0.0)
    # ---- halo rows: ReLU of the neighbor row, or zeros at the image border ----
    top = jnp.where(hi > 0, jnp.maximum(xtop_ref[0], 0.0), 0.0)        # (1, W, Cin)
    bot = jnp.where(hi < nh - 1, jnp.maximum(xbot_ref[0], 0.0), 0.0)   # (1, W, Cin)
    pad_ref[0:1, 1:W + 1, :] = top
    pad_ref[TH + 1:TH + 2, 1:W + 1, :] = bot

    # ---- im2col: stage the 9 shifted taps into one (TH, W, 9*Cin) bf16 buffer ----
    # (cast to the MXU dtype is fused into each staging store; no full-tensor cast)
    for ky in range(3):
        for kx in range(3):
            c0 = (ky * 3 + kx) * Cin
            col_ref[:, :, c0:c0 + Cin] = pad_ref[ky:ky + TH, kx:kx + W, :].astype(mxu_dtype)

    # ---- 3x3 conv: single MXU matmul, contraction depth 9*Cin, f32 accumulate ----
    patches = col_ref[...].reshape(TH * W, 9 * Cin)                # already bf16
    h = jnp.dot(patches, w1_ref[...], preferred_element_type=jnp.float32)
    h = jnp.maximum(h + b1_ref[...], 0.0)                          # bias + ReLU (f32, VPU)

    # ---- 1x1 conv: second MXU matmul ----
    y = jnp.dot(h.astype(mxu_dtype), w2_ref[...],
                preferred_element_type=jnp.float32) + b2_ref[...]  # (TH*W, Cin_p)

    # residual uses pre-ReLU x; drop the lane padding of the second matmul.
    out = x.reshape(TH * W, Cin) + y[:, :Cin]
    out_ref[0] = out.reshape(TH, W, Cin).astype(out_ref.dtype)


def _vmem_need_bytes(TH, W, Cin, Cout_p, Cin_p):
    f32, bf16 = 4, 2
    tile_io = TH * W * Cin * f32                      # one input / output tile
    halo_io = 2 * W * Cin * f32                       # two 1-row halo tiles
    pad_s = (TH + 2) * (W + 2) * Cin * f32            # single-instance scratch
    col_s = TH * W * 9 * Cin * bf16                   # single-instance scratch
    weights = (9 * Cin * Cout_p + Cout_p * Cin_p) * bf16 + (Cout_p + Cin_p) * f32
    mm_tmp = TH * W * (Cout_p + Cin_p) * f32 * 2 + col_s   # h, y, operand copies
    # double-buffered: in/out tiles, halo rows, weights (constant index but counted
    # conservatively twice); single-instance: scratches + matmul temporaries.
    return 2 * (2 * tile_io + halo_io + weights) + pad_s + col_s + mm_tmp


def _vmem_capacity_bytes():
    try:
        return int(getattr(pltpu.get_tpu_info(), "vmem_capacity_bytes", 64 * 1024 * 1024))
    except Exception:
        return 64 * 1024 * 1024   # conservative (v7x-sized) fallback


def _pick_tile_h(H, W, Cin, Cout_p, Cin_p, budget):
    for th in range(H, 0, -1):
        if H % th == 0 and _vmem_need_bytes(th, W, Cin, Cout_p, Cin_p) <= budget:
            return th
    return 1


def resblock_pallas(x_nhwc, w1_hwio, b1, w2_oi, b2, *, tile_h=None, mxu_dtype=MXU_DTYPE):
    """x_nhwc: (N, H, W, Cin); w1_hwio: (3, 3, Cin, Cout); w2_oi: (Cout, Cin)."""
    N, H, W, Cin = x_nhwc.shape
    Cout = w1_hwio.shape[-1]

    # ---- pad matmul output widths to the 128-lane MXU width (zero-filled -> exact) ----
    Cout_p = _round_up(Cout, LANE)
    Cin_p = _round_up(Cin, LANE)
    w1_flat = w1_hwio.reshape(9 * Cin, Cout).astype(jnp.float32)
    w1_p = jnp.zeros((9 * Cin, Cout_p), jnp.float32).at[:, :Cout].set(w1_flat).astype(mxu_dtype)
    b1_p = jnp.zeros((1, Cout_p), jnp.float32).at[0, :Cout].set(b1.astype(jnp.float32))
    w2_p = jnp.zeros((Cout_p, Cin_p), jnp.float32).at[:Cout, :Cin].set(
        w2_oi.astype(jnp.float32)).astype(mxu_dtype)
    b2_p = jnp.zeros((1, Cin_p), jnp.float32).at[0, :Cin].set(b2.astype(jnp.float32))

    # ---- per-generation VMEM budget & H-tile selection ----
    cap = _vmem_capacity_bytes()
    if tile_h is None:
        tile_h = _pick_tile_h(H, W, Cin, Cout_p, Cin_p, int(0.8 * cap))
    assert H % tile_h == 0, "tile_h must divide H"
    TH = tile_h
    nh = H // TH
    need = _vmem_need_bytes(TH, W, Cin, Cout_p, Cin_p)
    vmem_limit = int(min(max(need + (8 << 20), 32 << 20), int(0.9 * cap)))

    kernel = functools.partial(_resblock_kernel, TH=TH, W=W, Cin=Cin, mxu_dtype=mxu_dtype)

    flops = 2 * N * H * W * (9 * Cin * Cout + Cout * Cin)
    bytes_accessed = (2 * N * H * W * Cin * 4                       # x in + out
                      + N * nh * 2 * W * Cin * 4                    # halo-row re-reads
                      + (9 * Cin * Cout_p + Cout_p * Cin_p) * 2
                      + (Cout_p + Cin_p) * 4)

    return pl.pallas_call(
        kernel,
        out_shape=jax.ShapeDtypeStruct((N, H, W, Cin), x_nhwc.dtype),
        grid_spec=pltpu.PrefetchScalarGridSpec(
            num_scalar_prefetch=0,
            grid=(N, nh),
            in_specs=[
                pl.BlockSpec((1, TH, W, Cin), lambda n, h: (n, h, 0, 0)),
                # 1-row halo blocks: block size 1 along H => block index == row index
                pl.BlockSpec((1, 1, W, Cin),
                             lambda n, h: (n, jnp.maximum(h * TH - 1, 0), 0, 0)),
                pl.BlockSpec((1, 1, W, Cin),
                             lambda n, h: (n, jnp.minimum(h * TH + TH, H - 1), 0, 0)),
                pl.BlockSpec((9 * Cin, Cout_p), lambda n, h: (0, 0)),
                pl.BlockSpec((1, Cout_p), lambda n, h: (0, 0)),
                pl.BlockSpec((Cout_p, Cin_p), lambda n, h: (0, 0)),
                pl.BlockSpec((1, Cin_p), lambda n, h: (0, 0)),
            ],
            out_specs=pl.BlockSpec((1, TH, W, Cin), lambda n, h: (n, h, 0, 0)),
            scratch_shapes=[
                pltpu.VMEM((TH + 2, W + 2, Cin), jnp.float32),   # padded ReLU(x)
                pltpu.VMEM((TH, W, 9 * Cin), mxu_dtype),         # im2col patches (bf16)
            ],
        ),
        compiler_params=pltpu.CompilerParams(
            dimension_semantics=("parallel", "parallel"),
            vmem_limit_bytes=vmem_limit),
        cost_estimate=pl.CostEstimate(flops=flops, transcendentals=0,
                                      bytes_accessed=bytes_accessed),
    )(x_nhwc, x_nhwc, x_nhwc, w1_p, b1_p, w2_p, b2_p)


def resblock_reference(x_nhwc, w1_hwio, b1, w2_oi, b2):
    """Pure-JAX f32 reference matching the PyTorch ResBlock forward (NHWC)."""
    h = jnp.maximum(x_nhwc, 0.0)
    h = jax.lax.conv_general_dilated(
        h, w1_hwio, window_strides=(1, 1), padding=((1, 1), (1, 1)),
        dimension_numbers=("NHWC", "HWIO", "NHWC")) + b1
    h = jnp.maximum(h, 0.0)
    Cout, Cin = w2_oi.shape
    h = jax.lax.conv_general_dilated(
        h, w2_oi.reshape(1, 1, Cout, Cin), window_strides=(1, 1), padding="VALID",
        dimension_numbers=("NHWC", "HWIO", "NHWC")) + b2
    return x_nhwc + h


if __name__ == "__main__":
    N, Cin, Cout, H, W = 2, 4, 8, 16, 16

    key = jax.random.PRNGKey(0)
    kx_, kw1, kb1, kw2, kb2 = jax.random.split(key, 5)

    # deterministic synthetic params (shapes from nn.Conv2d in __init__)
    x_nchw = jax.random.normal(kx_, (N, Cin, H, W), jnp.float32)
    w1_oihw = jax.random.normal(kw1, (Cout, Cin, 3, 3), jnp.float32) * 0.1   # Conv2d(in, out, 3)
    b1 = jax.random.normal(kb1, (Cout,), jnp.float32) * 0.1
    w2_oihw = jax.random.normal(kw2, (Cin, Cout, 1, 1), jnp.float32) * 0.1   # Conv2d(out, in, 1)
    b2 = jax.random.normal(kb2, (Cin,), jnp.float32) * 0.1

    # NCHW -> NHWC, OIHW -> HWIO for the kernel layout
    x_nhwc = jnp.transpose(x_nchw, (0, 2, 3, 1))
    w1_hwio = jnp.transpose(w1_oihw, (2, 3, 1, 0))          # (3, 3, Cin, Cout)
    w2_mat = jnp.transpose(w2_oihw[:, :, 0, 0], (1, 0))     # (Cout, Cin)

    # tile_h=8 exercises the H-tiled 2-row-halo path (grid = (N, 2)).
    out = resblock_pallas(x_nhwc, w1_hwio, b1, w2_mat, b2, tile_h=8)
    out = jax.block_until_ready(out)

    ref = resblock_reference(x_nhwc, w1_hwio, b1, w2_mat, b2)
    # bf16 MXU operands with f32 accumulation -> looser tolerance vs. the f32 reference
    assert jnp.allclose(out, ref, atol=2e-2, rtol=2e-2), "mismatch vs reference"

    # result corresponds to PyTorch output transposed back: (N, Cin, H, W)
    _ = jnp.transpose(out, (0, 3, 1, 2))
    print("KERNEL_OK")
</pallas_src>

<mosaic_0001>
module attributes {stable_mosaic.version = 11 : i64} {
  func.func @_resblock_kernel(%arg0: i32, %arg1: i32, %arg2: memref<1x8x16x4xf32, #tpu.memory_space<vmem>>, %arg3: memref<1x1x16x4xf32, #tpu.memory_space<vmem>>, %arg4: memref<1x1x16x4xf32, #tpu.memory_space<vmem>>, %arg5: memref<36x128xbf16, #tpu.memory_space<vmem>>, %arg6: memref<1x128xf32, #tpu.memory_space<vmem>>, %arg7: memref<128x128xbf16, #tpu.memory_space<vmem>>, %arg8: memref<1x128xf32, #tpu.memory_space<vmem>>, %arg9: memref<1x8x16x4xf32, #tpu.memory_space<vmem>>, %arg10: memref<10x18x4xf32, #tpu.memory_space<vmem>>, %arg11: memref<8x16x36xbf16, #tpu.memory_space<vmem>>) attributes {dimension_semantics = [#tpu.dimension_semantics<parallel>, #tpu.dimension_semantics<parallel>], iteration_bounds = array<i64: 2, 2>, scalar_prefetch = 0 : i64, scratch_operands = 2 : i64, tpu.core_type = #tpu.core_type<tc>, window_params = [{transform_indices = @transform_0, window_bounds = array<i64: 1, 8, 16, 4>}, {transform_indices = @transform_1, window_bounds = array<i64: 1, 1, 16, 4>}, {transform_indices = @transform_2, window_bounds = array<i64: 1, 1, 16, 4>}, {pipeline_mode = #tpu.pipeline_mode<synchronous>, transform_indices = @transform_3, window_bounds = array<i64: 36, 128>}, {pipeline_mode = #tpu.pipeline_mode<synchronous>, transform_indices = @transform_4, window_bounds = array<i64: 1, 128>}, {pipeline_mode = #tpu.pipeline_mode<synchronous>, transform_indices = @transform_5, window_bounds = array<i64: 128, 128>}, {pipeline_mode = #tpu.pipeline_mode<synchronous>, transform_indices = @transform_6, window_bounds = array<i64: 1, 128>}, {transform_indices = @transform_7, window_bounds = array<i64: 1, 8, 16, 4>}]} {
    %c0 = arith.constant 0 : index
    %c0_0 = arith.constant 0 : index
    %c0_1 = arith.constant 0 : index
    %c0_2 = arith.constant 0 : index
    %0 = vector.load %arg2[%c0, %c0_0, %c0_1, %c0_2] : memref<1x8x16x4xf32, #tpu.memory_space<vmem>>, vector<1x8x16x4xf32>
    %1 = vector.shape_cast %0 : vector<1x8x16x4xf32> to vector<8x16x4xf32>
    %cst = arith.constant 0.000000e+00 : f32
    %2 = vector.broadcast %cst : f32 to vector<10x1x4xf32>
    %c0_3 = arith.constant 0 : index
    %c0_4 = arith.constant 0 : index
    %c0_5 = arith.constant 0 : index
    %3 = vector.load %arg10[%c0_3, %c0_4, %c0_5] : memref<10x18x4xf32, #tpu.memory_space<vmem>>, vector<10x1x4xf32>
    tpu.vector_store %arg10[%c0_3, %c0_4, %c0_5], %2 {strides = array<i32>} : memref<10x18x4xf32, #tpu.memory_space<vmem>>, vector<10x1x4xf32>,
    %cst_6 = arith.constant 0.000000e+00 : f32
    %4 = vector.broadcast %cst_6 : f32 to vector<10x1x4xf32>
    %c0_7 = arith.constant 0 : index
    %c17 = arith.constant 17 : index
    %c0_8 = arith.constant 0 : index
    %5 = vector.load %arg10[%c0_7, %c17, %c0_8] : memref<10x18x4xf32, #tpu.memory_space<vmem>>, vector<10x1x4xf32>
    tpu.vector_store %arg10[%c0_7, %c17, %c0_8], %4 {strides = array<i32>} : memref<10x18x4xf32, #tpu.memory_space<vmem>>, vector<10x1x4xf32>,
    %cst_9 = arith.constant 0.000000e+00 : f32
    %6 = vector.broadcast %cst_9 : f32 to vector<8x16x4xf32>
    %7 = arith.maximumf %1, %6 : vector<8x16x4xf32>
    %c1 = arith.constant 1 : index
    %c1_10 = arith.constant 1 : index
    %c0_11 = arith.constant 0 : index
    %8 = vector.load %arg10[%c1, %c1_10, %c0_11] : memref<10x18x4xf32, #tpu.memory_space<vmem>>, vector<8x16x4xf32>
    tpu.vector_store %arg10[%c1, %c1_10, %c0_11], %7 {strides = array<i32>} : memref<10x18x4xf32, #tpu.memory_space<vmem>>, vector<8x16x4xf32>,
    %c0_i32 = arith.constant 0 : i32
    %9 = arith.cmpi sgt, %arg1, %c0_i32 : i32
    %c0_12 = arith.constant 0 : index
    %c0_13 = arith.constant 0 : index
    %c0_14 = arith.constant 0 : index
    %c0_15 = arith.constant 0 : index
    %10 = vector.load %arg3[%c0_12, %c0_13, %c0_14, %c0_15] : memref<1x1x16x4xf32, #tpu.memory_space<vmem>>, vector<1x1x16x4xf32>
    %11 = vector.shape_cast %10 : vector<1x1x16x4xf32> to vector<1x16x4xf32>
    %cst_16 = arith.constant 0.000000e+00 : f32
    %12 = vector.broadcast %cst_16 : f32 to vector<1x16x4xf32>
    %13 = arith.maximumf %11, %12 : vector<1x16x4xf32>
    %cst_17 = arith.constant 0.000000e+00 : f32
    %14 = vector.broadcast %cst_17 : f32 to vector<1x16x4xf32>
    %15 = arith.select %9, %13, %14 : vector<1x16x4xf32>
    %c1_i32 = arith.constant 1 : i32
    %16 = arith.cmpi slt, %arg1, %c1_i32 : i32
    %c0_18 = arith.constant 0 : index
    %c0_19 = arith.constant 0 : index
    %c0_20 = arith.constant 0 : index
    %c0_21 = arith.constant 0 : index
    %17 = vector.load %arg4[%c0_18, %c0_19, %c0_20, %c0_21] : memref<1x1x16x4xf32, #tpu.memory_space<vmem>>, vector<1x1x16x4xf32>
    %18 = vector.shape_cast %17 : vector<1x1x16x4xf32> to vector<1x16x4xf32>
    %cst_22 = arith.constant 0.000000e+00 : f32
    %19 = vector.broadcast %cst_22 : f32 to vector<1x16x4xf32>
    %20 = arith.maximumf %18, %19 : vector<1x16x4xf32>
    %cst_23 = arith.constant 0.000000e+00 : f32
    %21 = vector.broadcast %cst_23 : f32 to vector<1x16x4xf32>
    %22 = arith.select %16, %20, %21 : vector<1x16x4xf32>
    %c0_24 = arith.constant 0 : index
    %c1_25 = arith.constant 1 : index
    %c0_26 = arith.constant 0 : index
    %23 = vector.load %arg10[%c0_24, %c1_25, %c0_26] : memref<10x18x4xf32, #tpu.memory_space<vmem>>, vector<1x16x4xf32>
    tpu.vector_store %arg10[%c0_24, %c1_25, %c0_26], %15 {strides = array<i32>} : memref<10x18x4xf32, #tpu.memory_space<vmem>>, vector<1x16x4xf32>,
    %c9 = arith.constant 9 : index
    %c1_27 = arith.constant 1 : index
    %c0_28 = arith.constant 0 : index
    %24 = vector.load %arg10[%c9, %c1_27, %c0_28] : memref<10x18x4xf32, #tpu.memory_space<vmem>>, vector<1x16x4xf32>
    tpu.vector_store %arg10[%c9, %c1_27, %c0_28], %22 {strides = array<i32>} : memref<10x18x4xf32, #tpu.memory_space<vmem>>, vector<1x16x4xf32>,
    %c0_29 = arith.constant 0 : index
    %c0_30 = arith.constant 0 : index
    %c0_31 = arith.constant 0 : index
    %25 = vector.load %arg10[%c0_29, %c0_30, %c0_31] : memref<10x18x4xf32, #tpu.memory_space<vmem>>, vector<8x16x4xf32>
    %26 = arith.truncf %25 : vector<8x16x4xf32> to vector<8x16x4xbf16>
    %c0_32 = arith.constant 0 : index
    %c0_33 = arith.constant 0 : index
    %c0_34 = arith.constant 0 : index
    %27 = vector.load %arg11[%c0_32, %c0_33, %c0_34] : memref<8x16x36xbf16, #tpu.memory_space<vmem>>, vector<8x16x4xbf16>
    tpu.vector_store %arg11[%c0_32, %c0_33, %c0_34], %26 {strides = array<i32>} : memref<8x16x36xbf16, #tpu.memory_space<vmem>>, vector<8x16x4xbf16>,
    %c0_35 = arith.constant 0 : index
    %c1_36 = arith.constant 1 : index
    %c0_37 = arith.constant 0 : index
    %28 = vector.load %arg10[%c0_35, %c1_36, %c0_37] : memref<10x18x4xf32, #tpu.memory_space<vmem>>, vector<8x16x4xf32>
    %29 = arith.truncf %28 : vector<8x16x4xf32> to vector<8x16x4xbf16>
    %c0_38 = arith.constant 0 : index
    %c0_39 = arith.constant 0 : index
    %c4 = arith.constant 4 : index
    %30 = vector.load %arg11[%c0_38, %c0_39, %c4] : memref<8x16x36xbf16, #tpu.memory_space<vmem>>, vector<8x16x4xbf16>
    tpu.vector_store %arg11[%c0_38, %c0_39, %c4], %29 {strides = array<i32>} : memref<8x16x36xbf16, #tpu.memory_space<vmem>>, vector<8x16x4xbf16>,
    %c0_40 = arith.constant 0 : index
    %c2 = arith.constant 2 : index
    %c0_41 = arith.constant 0 : index
    %31 = vector.load %arg10[%c0_40, %c2, %c0_41] : memref<10x18x4xf32, #tpu.memory_space<vmem>>, vector<8x16x4xf32>
    %32 = arith.truncf %31 : vector<8x16x4xf32> to vector<8x16x4xbf16>
    %c0_42 = arith.constant 0 : index
    %c0_43 = arith.constant 0 : index
    %c8 = arith.constant 8 : index
    %33 = vector.load %arg11[%c0_42, %c0_43, %c8] : memref<8x16x36xbf16, #tpu.memory_space<vmem>>, vector<8x16x4xbf16>
    tpu.vector_store %arg11[%c0_42, %c0_43, %c8], %32 {strides = array<i32>} : memref<8x16x36xbf16, #tpu.memory_space<vmem>>, vector<8x16x4xbf16>,
    %c1_44 = arith.constant 1 : index
    %c0_45 = arith.constant 0 : index
    %c0_46 = arith.constant 0 : index
    %34 = vector.load %arg10[%c1_44, %c0_45, %c0_46] : memref<10x18x4xf32, #tpu.memory_space<vmem>>, vector<8x16x4xf32>
    %35 = arith.truncf %34 : vector<8x16x4xf32> to vector<8x16x4xbf16>
    %c0_47 = arith.constant 0 : index
    %c0_48 = arith.constant 0 : index
    %c12 = arith.constant 12 : index
    %36 = vector.load %arg11[%c0_47, %c0_48, %c12] : memref<8x16x36xbf16, #tpu.memory_space<vmem>>, vector<8x16x4xbf16>
    tpu.vector_store %arg11[%c0_47, %c0_48, %c12], %35 {strides = array<i32>} : memref<8x16x36xbf16, #tpu.memory_space<vmem>>, vector<8x16x4xbf16>,
    %c1_49 = arith.constant 1 : index
    %c1_50 = arith.constant 1 : index
    %c0_51 = arith.constant 0 : index
    %37 = vector.load %arg10[%c1_49, %c1_50, %c0_51] : memref<10x18x4xf32, #tpu.memory_space<vmem>>, vector<8x16x4xf32>
    %38 = arith.truncf %37 : vector<8x16x4xf32> to vector<8x16x4xbf16>
    %c0_52 = arith.constant 0 : index
    %c0_53 = arith.constant 0 : index
    %c16 = arith.constant 16 : index
    %39 = vector.load %arg11[%c0_52, %c0_53, %c16] : memref<8x16x36xbf16, #tpu.memory_space<vmem>>, vector<8x16x4xbf16>
    tpu.vector_store %arg11[%c0_52, %c0_53, %c16], %38 {strides = array<i32>} : memref<8x16x36xbf16, #tpu.memory_space<vmem>>, vector<8x16x4xbf16>,
    %c1_54 = arith.constant 1 : index
    %c2_55 = arith.constant 2 : index
    %c0_56 = arith.constant 0 : index
    %40 = vector.load %arg10[%c1_54, %c2_55, %c0_56] : memref<10x18x4xf32, #tpu.memory_space<vmem>>, vector<8x16x4xf32>
    %41 = arith.truncf %40 : vector<8x16x4xf32> to vector<8x16x4xbf16>
    %c0_57 = arith.constant 0 : index
    %c0_58 = arith.constant 0 : index
    %c20 = arith.constant 20 : index
    %42 = vector.load %arg11[%c0_57, %c0_58, %c20] : memref<8x16x36xbf16, #tpu.memory_space<vmem>>, vector<8x16x4xbf16>
    tpu.vector_store %arg11[%c0_57, %c0_58, %c20], %41 {strides = array<i32>} : memref<8x16x36xbf16, #tpu.memory_space<vmem>>, vector<8x16x4xbf16>,
    %c2_59 = arith.constant 2 : index
    %c0_60 = arith.constant 0 : index
    %c0_61 = arith.constant 0 : index
    %43 = vector.load %arg10[%c2_59, %c0_60, %c0_61] : memref<10x18x4xf32, #tpu.memory_space<vmem>>, vector<8x16x4xf32>
    %44 = arith.truncf %43 : vector<8x16x4xf32> to vector<8x16x4xbf16>
    %c0_62 = arith.constant 0 : index
    %c0_63 = arith.constant 0 : index
    %c24 = arith.constant 24 : index
    %45 = vector.load %arg11[%c0_62, %c0_63, %c24] : memref<8x16x36xbf16, #tpu.memory_space<vmem>>, vector<8x16x4xbf16>
    tpu.vector_store %arg11[%c0_62, %c0_63, %c24], %44 {strides = array<i32>} : memref<8x16x36xbf16, #tpu.memory_space<vmem>>, vector<8x16x4xbf16>,
    %c2_64 = arith.constant 2 : index
    %c1_65 = arith.constant 1 : index
    %c0_66 = arith.constant 0 : index
    %46 = vector.load %arg10[%c2_64, %c1_65, %c0_66] : memref<10x18x4xf32, #tpu.memory_space<vmem>>, vector<8x16x4xf32>
    %47 = arith.truncf %46 : vector<8x16x4xf32> to vector<8x16x4xbf16>
    %c0_67 = arith.constant 0 : index
    %c0_68 = arith.constant 0 : index
    %c28 = arith.constant 28 : index
    %48 = vector.load %arg11[%c0_67, %c0_68, %c28] : memref<8x16x36xbf16, #tpu.memory_space<vmem>>, vector<8x16x4xbf16>
    tpu.vector_store %arg11[%c0_67, %c0_68, %c28], %47 {strides = array<i32>} : memref<8x16x36xbf16, #tpu.memory_space<vmem>>, vector<8x16x4xbf16>,
    %c2_69 = arith.constant 2 : index
    %c2_70 = arith.constant 2 : index
    %c0_71 = arith.constant 0 : index
    %49 = vector.load %arg10[%c2_69, %c2_70, %c0_71] : memref<10x18x4xf32, #tpu.memory_space<vmem>>, vector<8x16x4xf32>
    %50 = arith.truncf %49 : vector<8x16x4xf32> to vector<8x16x4xbf16>
    %c0_72 = arith.constant 0 : index
    %c0_73 = arith.constant 0 : index
    %c32 = arith.constant 32 : index
    %51 = vector.load %arg11[%c0_72, %c0_73, %c32] : memref<8x16x36xbf16, #tpu.memory_space<vmem>>, vector<8x16x4xbf16>
    tpu.vector_store %arg11[%c0_72, %c0_73, %c32], %50 {strides = array<i32>} : memref<8x16x36xbf16, #tpu.memory_space<vmem>>, vector<8x16x4xbf16>,
    %c0_74 = arith.constant 0 : index
    %c0_75 = arith.constant 0 : index
    %c0_76 = arith.constant 0 : index
    %52 = vector.load %arg11[%c0_74, %c0_75, %c0_76] : memref<8x16x36xbf16, #tpu.memory_space<vmem>>, vector<8x16x36xbf16>
    %53 = vector.shape_cast %52 : vector<8x16x36xbf16> to vector<128x36xbf16>
    %c0_77 = arith.constant 0 : index
    %c0_78 = arith.constant 0 : index
    %54 = vector.load %arg5[%c0_77, %c0_78] : memref<36x128xbf16, #tpu.memory_space<vmem>>, vector<36x128xbf16>
    %cst_79 = arith.constant dense<0.000000e+00> : vector<128x128xf32>
    %55 = tpu.matmul %53, %54, %cst_79 {dimension_numbers = #tpu.dot_dimension_numbers<[1], [0], [0], [1], [0, 0, 1, 1], [], []>} : vector<128x36xbf16>, vector<36x128xbf16>, vector<128x128xf32> -> vector<128x128xf32>
    %c0_80 = arith.constant 0 : index
    %c0_81 = arith.constant 0 : index
    %56 = vector.load %arg6[%c0_80, %c0_81] : memref<1x128xf32, #tpu.memory_space<vmem>>, vector<1x128xf32>
    %57 = vector.broadcast %56 : vector<1x128xf32> to vector<128x128xf32>
    %58 = arith.addf %55, %57 : vector<128x128xf32>
    %cst_82 = arith.constant 0.000000e+00 : f32
    %59 = vector.broadcast %cst_82 : f32 to vector<128x128xf32>
    %60 = arith.maximumf %58, %59 : vector<128x128xf32>
    %61 = arith.truncf %60 : vector<128x128xf32> to vector<128x128xbf16>
    %c0_83 = arith.constant 0 : index
    %c0_84 = arith.constant 0 : index
    %62 = vector.load %arg7[%c0_83, %c0_84] : memref<128x128xbf16, #tpu.memory_space<vmem>>, vector<128x128xbf16>
    %cst_85 = arith.constant dense<0.000000e+00> : vector<128x128xf32>
    %63 = tpu.matmul %61, %62, %cst_85 {dimension_numbers = #tpu.dot_dimension_numbers<[1], [0], [0], [1], [0, 0, 1, 1], [], []>} : vector<128x128xbf16>, vector<128x128xbf16>, vector<128x128xf32> -> vector<128x128xf32>
    %c0_86 = arith.constant 0 : index
    %c0_87 = arith.constant 0 : index
    %64 = vector.load %arg8[%c0_86, %c0_87] : memref<1x128xf32, #tpu.memory_space<vmem>>, vector<1x128xf32>
    %65 = vector.broadcast %64 : vector<1x128xf32> to vector<128x128xf32>
    %66 = arith.addf %63, %65 : vector<128x128xf32>
    %67 = vector.shape_cast %1 : vector<8x16x4xf32> to vector<128x4xf32>
    %68 = vector.extract_strided_slice %66 {offsets = [0, 0], sizes = [128, 4], strides = [1, 1]} : vector<128x128xf32> to vector<128x4xf32>
    %69 = arith.addf %67, %68 : vector<128x4xf32>
    %70 = vector.shape_cast %69 : vector<128x4xf32> to vector<8x16x4xf32>
    %c0_88 = arith.constant 0 : index
    %c0_89 = arith.constant 0 : index
    %c0_90 = arith.constant 0 : index
    %c0_91 = arith.constant 0 : index
    %71 = vector.load %arg9[%c0_88, %c0_89, %c0_90, %c0_91] : memref<1x8x16x4xf32, #tpu.memory_space<vmem>>, vector<1x8x16x4xf32>
    %72 = vector.shape_cast %71 : vector<1x8x16x4xf32> to vector<8x16x4xf32>
    %73 = vector.shape_cast %70 : vector<8x16x4xf32> to vector<1x8x16x4xf32>
    tpu.vector_store %arg9[%c0_88, %c0_89, %c0_90, %c0_91], %73 {strides = array<i32>} : memref<1x8x16x4xf32, #tpu.memory_space<vmem>>, vector<1x8x16x4xf32>,
    return
  }
  func.func @transform_0(%arg0: i32, %arg1: i32) -> (i32, i32, i32, i32) {
    %c0_i32 = arith.constant 0 : i32
    %c0_i32_0 = arith.constant 0 : i32
    %c0_i32_1 = arith.constant 0 : i32
    return %arg0, %arg1, %c0_i32, %c0_i32_0 : i32, i32, i32, i32
  }
  func.func @transform_1(%arg0: i32, %arg1: i32) -> (i32, i32, i32, i32) {
    %c8_i32 = arith.constant 8 : i32
    %0 = arith.muli %arg1, %c8_i32 : i32
    %c1_i32 = arith.constant 1 : i32
    %1 = arith.subi %0, %c1_i32 : i32
    %c0_i32 = arith.constant 0 : i32
    %2 = arith.maxsi %1, %c0_i32 : i32
    %c0_i32_0 = arith.constant 0 : i32
    %c0_i32_1 = arith.constant 0 : i32
    %c0_i32_2 = arith.constant 0 : i32
    return %arg0, %2, %c0_i32_0, %c0_i32_1 : i32, i32, i32, i32
  }
  func.func @transform_2(%arg0: i32, %arg1: i32) -> (i32, i32, i32, i32) {
    %c8_i32 = arith.constant 8 : i32
    %0 = arith.muli %arg1, %c8_i32 : i32
    %c8_i32_0 = arith.constant 8 : i32
    %1 = arith.addi %0, %c8_i32_0 : i32
    %c15_i32 = arith.constant 15 : i32
    %2 = arith.minsi %1, %c15_i32 : i32
    %c0_i32 = arith.constant 0 : i32
    %c0_i32_1 = arith.constant 0 : i32
    %c0_i32_2 = arith.constant 0 : i32
    return %arg0, %2, %c0_i32, %c0_i32_1 : i32, i32, i32, i32
  }
  func.func @transform_3(%arg0: i32, %arg1: i32) -> (i32, i32) {
    %c0_i32 = arith.constant 0 : i32
    %c0_i32_0 = arith.constant 0 : i32
    %c0_i32_1 = arith.constant 0 : i32
    return %c0_i32, %c0_i32_0 : i32, i32
  }
  func.func @transform_4(%arg0: i32, %arg1: i32) -> (i32, i32) {
    %c0_i32 = arith.constant 0 : i32
    %c0_i32_0 = arith.constant 0 : i32
    %c0_i32_1 = arith.constant 0 : i32
    return %c0_i32, %c0_i32_0 : i32, i32
  }
  func.func @transform_5(%arg0: i32, %arg1: i32) -> (i32, i32) {
    %c0_i32 = arith.constant 0 : i32
    %c0_i32_0 = arith.constant 0 : i32
    %c0_i32_1 = arith.constant 0 : i32
    return %c0_i32, %c0_i32_0 : i32, i32
  }
  func.func @transform_6(%arg0: i32, %arg1: i32) -> (i32, i32) {
    %c0_i32 = arith.constant 0 : i32
    %c0_i32_0 = arith.constant 0 : i32
    %c0_i32_1 = arith.constant 0 : i32
    return %c0_i32, %c0_i32_0 : i32, i32
  }
  func.func @transform_7(%arg0: i32, %arg1: i32) -> (i32, i32, i32, i32) {
    %c0_i32 = arith.constant 0 : i32
    %c0_i32_0 = arith.constant 0 : i32
    %c0_i32_1 = arith.constant 0 : i32
    return %arg0, %arg1, %c0_i32, %c0_i32_0 : i32, i32, i32, i32
  }
}

</mosaic_0001>

<bundles_post_ra>
// kernel: tpu_custom_call.1
= control target key start
LH: loop header
LB: loop body
LE: loop exit
PB: predicated region body
PF: predicated region fallthrough
CT: control target
= control target key end

     0   :  { %s2271_s24 = smov 0   ;;  %s2273_s25 = smov 0   ;;  %s3037_s0 = inlined_call_operand.vmem [shape: f32[2,16,16,4], index: 0, kind: input, shape index: {}]   ;;  %s3038_s1 = inlined_call_operand.vmem [shape: f32[2,16,16,4], index: 1, kind: input, shape index: {}]   ;;  %s3039_s2 = inlined_call_operand.vmem [shape: f32[2,16,16,4], index: 2, kind: input, shape index: {}]   ;;  %s3040_s3 = inlined_call_operand.vmem [shape: bf16[36,128], index: 3, kind: input, shape index: {}]   ;;  %s3041_s4 = inlined_call_operand.vmem [shape: f32[1,128], index: 4, kind: input, shape index: {}]   ;;  %s3042_s5 = inlined_call_operand.vmem [shape: bf16[128,128], index: 5, kind: input, shape index: {}]   ;;  %s3043_s6 = inlined_call_operand.vmem [shape: f32[1,128], index: 6, kind: input, shape index: {}]   ;;  %s3044_s7 = inlined_call_operand.vmem [shape: f32[2,16,16,4], index: 7, kind: output, shape index: {}]  }
   0x1   :  { %s2275_s26 = smov 0   ;;  %s2277_s27 = smov 0  }
   0x2   :  { %s2279_s28 = smov 0  }
   0x3 LB: > { %s26_s29 = sadd.s32 1, %s2212_s26  ;;  %s29_s30 = sadd.s32 1, %s2216_s27  ;;  %s2220_s28 = sphi %s2279_s28, %s17_s28   ;;  %s2216_s27 = sphi %s2277_s27, %s3051_s27   ;;  %s2212_s26 = sphi %s2275_s26, %s3050_s26   ;;  %s2208_s25 = sphi %s2273_s25, %s3049_s25   ;;  %s2204_s24 = sphi %s2271_s24, %s3048_s24  }
   0x4   : > { %p27_p0 = scmp.ge.s32.totalorder %s26_s29, 2  ;;  %p1980_p1 = scmp.ge.s32.totalorder %s2220_s28, 1 }
   0x5   : > { %p323_p2 = scmp.lt.s32.totalorder %s2220_s28, 5 }
   0x6   : > { %s3053_s29 = smov (%p27_p0, %s26_s29), 0  ;;  %s3055_s30 = smov (!%p27_p0, %s29_s30), %s2216_s27 }
   0x7   : > { %p324_p3 = pnand %p1980_p1, %p323_p2  ;;  %p31_p4 = scmp.ge.s32.totalorder %s3055_s30, 2 }
   0x8   : > { %s2304_s8 = sshll.u32 (!%p324_p3), %s2204_s24, 3  ;;  %p392_p5 = scmp.lt.s32.totalorder (!%p324_p3), %s2208_s25, 1 }
   0x9   : > { %s3057_s30 = smov (%p31_p4, %s3055_s30), 0  ;;  %327 = sbr.rel (%p324_p3) target bundleno = 787 (0x313), region = 48 }
   0xa   : > { %p394_p6 = scmp.lt.s32.totalorder (!%p324_p3), %s2304_s8, 15  ;;  %s1986_s13 = sadd.s32 (!%p324_p3), 4294967295, %s2304_s8 }
   0xb   : > { %p404_p7 = scmp.gt.s32.totalorder (!%p324_p3), %s1986_s13, 0  ;;  %p1987_p8 = scmp.lt.s32.totalorder (!%p324_p3), %s1986_s13, 15 }
   0xc   : > { %p519_p9 = scmp.gt.s32.totalorder (!%p324_p3), %s2204_s24, 0  ;;  %s2226_s15 = smov (!%p324_p3), 20  }
   0xd   : > { %s2227_s16 = smov (!%p324_p3), 8   ;;  %s420_s23 = sadd.s32 (!%p324_p3), 8, %s2304_s8 }
   0xe   : > { %vm464_vm0 = vcmask 24576   ;;  %v2222_v0 = vmov 0.0   ;;  %s3059_s25 = smov (!%p392_p5, %s2208_s25), 1  ;;  %vm502_vm1 = vcmask 31744   ;;  %s3061_s13 = smov (!%p404_p7, %s1986_s13), 0  ;;  %vm576_vm3 = vcmask 27648  }
   0xf   : > { %467 = vst.msk [vmem:[#allocation2 + $0x30] sm:$0x1] %vm464_vm0, %v2222_v0  ;;  %s395_s9 = scalar_select %p394_p6, %s2304_s8, 15  ;;  %vm1603_vm4 = vcmask 1041408   ;;  %vm689_vm5 = vcmask 60448   ;;  %vm802_vm6 = vcmask 93248  }
  0x10   : > { %465 = vst.msk [vmem:[#allocation2] sm:$0x1] %vm464_vm0, %v2222_v0  ;;  %s2314_s10 = sshll.u32 %s3059_s25, 5  ;;  %s3063_s13 = smov (!%p1987_p8, %s3061_s13), 15  ;;  %vm915_vm7 = vcmask 126048   ;;  %vm1028_vm8 = vcmask 158848  }
  0x11   : > { %466 = vst.msk [vmem:[#allocation2 + $0x18] sm:$0x1] %vm464_vm0, %v2222_v0  ;;  %s1982_s11 = sshll.u32 %s395_s9, 1  ;;  %s1992_s19 = sshll.u32 %s3063_s13, 1  ;;  %vm1141_vm9 = vcmask 191648   ;;  %vm1255_vm10 = vcmask 224448  }
  0x12   : > { %468 = vst.msk [vmem:[#allocation2 + $0x48] sm:$0x1] %vm464_vm0, %v2222_v0  ;;  %s2321_s12 = sadd.s32 %s2314_s10, %s1982_s11  ;;  %s412_s20 = sadd.s32 %s1992_s19, %s2314_s10  ;;  %vm1368_vm11 = vcmask 257248   ;;  %vm1481_vm12 = vcmask 290048   ;;  %vm1578_vm13 = vcmask 293888  }
  0x13   : > { %469 = vst.msk [vmem:[#allocation2 + $0x60] sm:$0x1] %vm464_vm0, %v2222_v0  ;;  %s3045_s14 = sshll.u32 %s2321_s12, 3  ;;  %s1994_s21 = sshll.u32 %s412_s20, 3 }
  0x14   : > { %470 = vst.msk [vmem:[#allocation2 + $0x78] sm:$0x1] %vm464_vm0, %v2222_v0  ;;  %s2334_s17 = scalar_lea.vmem %s3037_s0, %s3045_s14  ;;  %s414_s25 = scalar_lea.vmem %s3038_s1, %s1994_s21 }
  0x15   : > { %471 = vst.msk [vmem:[#allocation2 + $0x90] sm:$0x1] %vm464_vm0, %v2222_v0  ;;  %v449_v1 = vld [vmem:[%s2334_s17 + $0x8] sm:$0xff]  ;;  %v448_v2 = vld [vmem:[%s2334_s17] sm:$0xff]  ;;  %v450_v3 = vld [vmem:[%s2334_s17 + $0x10] sm:$0xff]  ;;  %s2223_s9 = smov 16  }
  0x16   : > { %472 = vst.msk [vmem:[#allocation2 + $0xa8] sm:$0x1] %vm464_vm0, %v2222_v0  ;;  %v486_v4 = vmax.f32 %v449_v1, 0.0  ;;  %v485_v5 = vmax.f32 %v448_v2, 0.0  ;;  %v487_v6 = vmax.f32 %v450_v3, 0.0  ;;  %v520_v8 = vld [vmem:[%s414_s25] sm:$0xff] }
  0x17   : > { %473 = vst.msk [vmem:[#allocation2 + $0xc0] sm:$0x1] %vm464_vm0, %v2222_v0  ;;  %s524_s18 = scalar_select %p519_p9, 1, 0  ;;  %v521_v9 = vld [vmem:[%s414_s25 + $0x8] sm:$0xff]  ;;  %v522_v10 = vmax.f32 %v520_v8, 0.0 }
  0x18   : > { %474 = vst.msk [vmem:[#allocation2 + $0xd8] sm:$0x1] %vm464_vm0, %v2222_v0  ;;  %v523_v11 = vmax.f32 %v521_v9, 0.0  ;;  %v451_v13 = vld [vmem:[%s2334_s17 + $0x18] sm:$0xff]  ;;  %s2224_s11 = smov 12   ;;  %s2225_s13 = smov 24  }
  0x19   : > { %475 = vst.msk [vmem:[#allocation2 + $0x11] sm:$0x1] %vm464_vm0, %v2222_v0  ;;  %v525_v7 = vstv %s524_s18  ;;  %v488_v21 = vmax.f32 %v451_v13, 0.0  ;;  %s2228_s18 = smov 4   ;;  %v452_v44 = vld [vmem:[%s2334_s17 + $0x20] sm:$0xff]  ;;  %v453_v45 = vld [vmem:[%s2334_s17 + $0x28] sm:$0xff] }
  0x1a   : > { %504 = vst.msk [vmem:[#allocation2 + $0x21] sm:$0xff] %vm502_vm1, %v486_v4  ;;  %vm526_vm2 = vcmp.eq.s32.totalorder %v525_v7, 1  ;;  %v489_v48 = vmax.f32 %v452_v44, 0.0  ;;  %v490_v49 = vmax.f32 %v453_v45, 0.0  ;;  %s2229_s19 = smov 28   ;;  %s2230_s20 = smov 32  }
  0x1b   : > { %503 = vst.msk [vmem:[#allocation2 + $0x19] sm:$0xff] %vm502_vm1, %v485_v5  ;;  %v527_v18 = vsel %vm526_vm2, %v522_v10, 0.0  ;;  %v528_v20 = vsel %vm526_vm2, %v523_v11, 0.0  ;;  %v454_v58 = vld [vmem:[%s2334_s17 + $0x30] sm:$0xff]  ;;  %v455_v59 = vld [vmem:[%s2334_s17 + $0x38] sm:$0xff]  ;;  %p2774_p10 = scmp.lt.s32.totalorder %s420_s23, 15 }
  0x1c   : > { %505 = vst.msk [vmem:[#allocation2 + $0x31] sm:$0xff] %vm502_vm1, %v487_v6  ;;  %v491_v62 = vmax.f32 %v454_v58, 0.0  ;;  %v492_v63 = vmax.f32 %v455_v59, 0.0  ;;  %v458_v59 = vld [vmem:[%s2334_s17 + $0x50] sm:$0xff]  ;;  %p529_p11 = scmp.lt.s32.totalorder %s2204_s24, 1 }
  0x1d   : > { %476 = vst.msk [vmem:[#allocation2 + $0x29] sm:$0x1] %vm464_vm0, %v2222_v0  ;;  %s3065_s23 = smov (!%p2774_p10, %s420_s23), 15 }
  0x1e   : > { %477 = vst.msk [vmem:[#allocation2 + $0x41] sm:$0x1] %vm464_vm0, %v2222_v0  ;;  %s3067_s23 = smov (!%p2774_p10, %s3065_s23), 15 }
  0x1f   : > { %478 = vst.msk [vmem:[#allocation2 + $0x59] sm:$0x1] %vm464_vm0, %v2222_v0  ;;  %s1999_s22 = sshll.u32 %s3067_s23, 1 }
  0x20   : > { %479 = vst.msk [vmem:[#allocation2 + $0x71] sm:$0x1] %vm464_vm0, %v2222_v0  ;;  %s429_s21 = sadd.s32 %s1999_s22, %s2314_s10 }
  0x21   : > { %v933_v12 = vld [vmem:[#allocation2 + $0x21] sm:$0xff]  ;;  %480 = vst.msk [vmem:[#allocation2 + $0x89] sm:$0x1] %vm464_vm0, %v2222_v0  ;;  %s2001_s23 = sshll.u32 %s429_s21, 3 }
  0x22   : > { %v2366_v14 = vpack.c.bf16 %v933_v12, %v933_v12  ;;  %v932_v15 = vld [vmem:[#allocation2 + $0x19] sm:$0xff]  ;;  %481 = vst.msk [vmem:[#allocation2 + $0xa1] sm:$0x1] %vm464_vm0, %v2222_v0  ;;  %s431_s10 = scalar_lea.vmem %s3039_s2, %s2001_s23 }
  0x23   : > { %v819_v16 = vld [vmem:[#allocation2 + $0x18] sm:$0xff]  ;;  %v2370_v17 = vpack.c.bf16 %v932_v15, %v932_v15  ;;  %482 = vst.msk [vmem:[#allocation2 + $0xb9] sm:$0x1] %vm464_vm0, %v2222_v0  ;;  %v1159_v22 = vld [vmem:[#allocation2 + $0x30] sm:$0xff]  ;;  %v820_v24 = vld [vmem:[#allocation2 + $0x20] sm:$0xff] }
  0x24   : > { %v2374_v19 = vpack.c.bf16 %v819_v16, %v819_v16  ;;  %982 = vrot.lane.b32.xlu1 %v2366_v14, %s2223_s9  ;;  %483 = vst.msk [vmem:[#allocation2 + $0xd1] sm:$0x1] %vm464_vm0, %v2222_v0  ;;  %v1046_v23 = vld [vmem:[#allocation2 + $0x22] sm:$0xff]  ;;  %v2388_v25 = vpack.c.bf16 %v1159_v22, %v1159_v22  ;;  %v2391_v27 = vpack.c.bf16 %v820_v24, %v820_v24  ;;  %v1045_v30 = vld [vmem:[#allocation2 + $0x1a] sm:$0xff]  ;;  %v1272_v41 = vld [vmem:[#allocation2 + $0x31] sm:$0xff] }
  0x25   : > { %980 = vrot.lane.b32.xlu0 %v2370_v17, %s2223_s9  ;;  %484 = vst.msk [vmem:[#allocation2 + $0xe9] sm:$0x1] %vm464_vm0, %v2222_v0  ;;  %v1062_v26 = vpack.c.bf16 %v1046_v23, %v1046_v23  ;;  %v1061_v33 = vpack.c.bf16 %v1045_v30, %v1045_v30  ;;  %v1288_v46 = vpack.c.bf16 %v1272_v41, %v1272_v41  ;;  %v456_v16 = vld [vmem:[%s2334_s17 + $0x40] sm:$0xff]  ;;  %s534_s14 = scalar_select %p529_p11, 1, 0 }
  0x26   : > { %867 = vrot.lane.b32.xlu2 %v2374_v19, %s2224_s11  ;;  %539 = vst.msk [vmem:[#allocation2 + $0x1] sm:$0xff] %vm502_vm1, %v527_v18  ;;  %v493_v18 = vmax.f32 %v456_v16, 0.0 }
  0x27   : > { %540 = vst.msk [vmem:[#allocation2 + $0x9] sm:$0xff] %vm502_vm1, %v528_v20 }
  0x28   : > { %506 = vst.msk [vmem:[#allocation2 + $0x39] sm:$0xff] %vm502_vm1, %v488_v21 }
  0x29   : > { %507 = vst.msk [vmem:[#allocation2 + $0x49] sm:$0xff] %vm502_vm1, %v489_v48 }
  0x2a   : > { %508 = vst.msk [vmem:[#allocation2 + $0x51] sm:$0xff] %vm502_vm1, %v490_v49 }
  0x2b   : > { %509 = vst.msk [vmem:[#allocation2 + $0x61] sm:$0xff] %vm502_vm1, %v491_v62 }
  0x2c   : > { %1207 = vrot.lane.b32.xlu1 %v2388_v25, %s2225_s13  ;;  %510 = vst.msk [vmem:[#allocation2 + $0x69] sm:$0xff] %vm502_vm1, %v492_v63  ;;  %v495_v63 = vmax.f32 %v458_v59, 0.0  ;;  %v2107_v59 = vld [vmem:[%s3042_s5 + $0x38] sm:$0xff] }
  0x2d   : > { %1095 = vrot.lane.b32.xlu0 %v1062_v26, %s2226_s15  ;;  %v593_v29 = vld [vmem:[#allocation2 + $0x1] sm:$0xff]  ;;  %579 = vst.msk [vmem:[#allocation3 + $0x8] sm:$0xf] %vm576_vm3, %v2374_v19  ;;  %1748 = vmatpush.bf16.msra.mxu1 %v2107_v59 }
  0x2e   : > { %869 = vrot.lane.b32.xlu2 %v2391_v27, %s2224_s11  ;;  %v706_v28 = vld [vmem:[#allocation2 + $0x2] sm:$0xff]  ;;  %v609_v32 = vpack.c.bf16 %v593_v29, %v593_v29  ;;  %v707_v34 = vld [vmem:[#allocation2 + $0xa] sm:$0xff]  ;;  %580 = vst.msk [vmem:[#allocation3 + $0xc] sm:$0xf] %vm576_vm3, %v2391_v27  ;;  %2111 = vmatpush.bf16.msra.mxu2 %v2107_v59 }
  0x2f   : > { %v722_v31 = vpack.c.bf16 %v706_v28, %v706_v28  ;;  %v594_v35 = vld [vmem:[#allocation2 + $0x9] sm:$0xff]  ;;  %v1160_v36 = vld [vmem:[#allocation2 + $0x38] sm:$0xff]  ;;  %v723_v37 = vpack.c.bf16 %v707_v34, %v707_v34  ;;  %v544_v5 = vld [vmem:[#allocation2] sm:$0xff]  ;;  %581 = vst.msk [vmem:[#allocation3 + $0x10] sm:$0xf] %vm576_vm3, %v2388_v25 }
  0x30   : > { %v610_v38 = vpack.c.bf16 %v594_v35, %v594_v35  ;;  %v2401_v39 = vpack.c.bf16 %v1160_v36, %v1160_v36  ;;  %v1273_v40 = vld [vmem:[#allocation2 + $0x39] sm:$0xff]  ;;  %v1161_v52 = vld [vmem:[#allocation2 + $0x48] sm:$0xff]  ;;  %v560_v6 = vpack.c.bf16 %v544_v5, %v544_v5  ;;  %511 = vst.msk [vmem:[#allocation2 + $0x79] sm:$0xff] %vm502_vm1, %v493_v18 }
  0x31   : > { %v1385_v42 = vld [vmem:[#allocation2 + $0x32] sm:$0xff]  ;;  %v1289_v43 = vpack.c.bf16 %v1273_v40, %v1273_v40  ;;  %v1386_v50 = vld [vmem:[#allocation2 + $0x3a] sm:$0xff]  ;;  %v1177_v53 = vpack.c.bf16 %v1161_v52, %v1161_v52  ;;  %v1274_v54 = vld [vmem:[#allocation2 + $0x49] sm:$0xff]  ;;  %513 = vst.msk [vmem:[#allocation2 + $0x91] sm:$0xff] %vm502_vm1, %v495_v63 }
  0x32   : > { %v1401_v47 = vpack.c.bf16 %v1385_v42, %v1385_v42  ;;  %v1402_v51 = vpack.c.bf16 %v1386_v50, %v1386_v50  ;;  %v1162_v55 = vld [vmem:[#allocation2 + $0x50] sm:$0xff]  ;;  %v2430_v57 = vpack.c.bf16 %v1274_v54, %v1274_v54  ;;  %577 = vst.msk [vmem:[#allocation3] sm:$0xf] %vm576_vm3, %v560_v6  ;;  %v1163_v8 = vld [vmem:[#allocation2 + $0x60] sm:$0xff]  ;;  %v545_v11 = vld [vmem:[#allocation2 + $0x8] sm:$0xff] }
  0x33   : > { %v1275_v56 = vld [vmem:[#allocation2 + $0x51] sm:$0xff]  ;;  %v1178_v60 = vpack.c.bf16 %v1162_v55, %v1162_v55  ;;  %v1164_v9 = vld [vmem:[#allocation2 + $0x68] sm:$0xff]  ;;  %582 = vst.msk [vmem:[#allocation3 + $0x14] sm:$0xf] %vm576_vm3, %v2401_v39  ;;  %v2474_v10 = vpack.c.bf16 %v1163_v8, %v1163_v8  ;;  %v561_v12 = vpack.c.bf16 %v545_v11, %v545_v11  ;;  %v2098_v40 = vld [vmem:[%s3040_s3] sm:$0xff] }
  0x34   : > { %754 = vrot.lane.b32.xlu1 %v722_v31, %s2227_s16  ;;  %v2434_v61 = vpack.c.bf16 %v1275_v56, %v1275_v56  ;;  %v1388_v0 = vld [vmem:[#allocation2 + $0x52] sm:$0xff]  ;;  %v1387_v1 = vld [vmem:[#allocation2 + $0x4a] sm:$0xff]  ;;  %583 = vst.msk [vmem:[#allocation3 + $0x18] sm:$0xf] %vm576_vm3, %v1177_v53  ;;  %v2482_v13 = vpack.c.bf16 %v1164_v9, %v1164_v9  ;;  %v1389_v19 = vld [vmem:[#allocation2 + $0x62] sm:$0xff] }
  0x35   : > { %641 = vrot.lane.b32.xlu0 %v609_v32, %s2228_s18  ;;  %v2443_v2 = vpack.c.bf16 %v1388_v0, %v1388_v0  ;;  %v2445_v3 = vpack.c.bf16 %v1387_v1, %v1387_v1  ;;  %584 = vst.msk [vmem:[#allocation3 + $0x1c] sm:$0xf] %vm576_vm3, %v1178_v60  ;;  %v1277_v21 = vld [vmem:[#allocation2 + $0x69] sm:$0xff] }
  0x36   : > { %1093 = vrot.lane.b32.xlu2 %v1061_v33, %s2226_s15  ;;  %585 = vst.msk [vmem:[#allocation3 + $0x20] sm:$0xf] %vm576_vm3, %v2474_v10  ;;  %v1390_v22 = vld [vmem:[#allocation2 + $0x6a] sm:$0xff]  ;;  %v2507_v28 = vpack.c.bf16 %v1277_v21, %v1277_v21 }
  0x37   : > { %578 = vst.msk [vmem:[#allocation3 + $0x4] sm:$0xf] %vm576_vm3, %v561_v12  ;;  %v457_v27 = vld [vmem:[%s2334_s17 + $0x48] sm:$0xff]  ;;  %v2509_v29 = vpack.c.bf16 %v1390_v22, %v1390_v22  ;;  %v1165_v32 = vld [vmem:[#allocation2 + $0x78] sm:$0xff] }
  0x38   : > { %586 = vst.msk [vmem:[#allocation3 + $0x24] sm:$0xf] %vm576_vm3, %v2482_v13  ;;  %v494_v31 = vmax.f32 %v457_v27, 0.0  ;;  %v1278_v54 = vld [vmem:[#allocation2 + $0x79] sm:$0xff]  ;;  %v2649_v27 = vld [vmem:[%s2334_s17 + $0x68] sm:$0xff] }
  0x3a   : > { %512 = vst.msk [vmem:[#allocation2 + $0x81] sm:$0xff] %vm502_vm1, %v494_v31 }
  0x3c   : > { %756 = vrot.lane.b32.xlu1 %v723_v37, %s2227_s16 }
  0x3d   : > { %643 = vrot.lane.b32.xlu0 %v610_v38, %s2228_s18 }
  0x3e   : > { %1209 = vrot.lane.b32.xlu2 %v2401_v39, %s2225_s13 }
  0x41   : > { %v1279_v52 = vld [vmem:[#allocation2 + $0x81] sm:$0xff] }
  0x42   : > { %v1391_v55 = vld [vmem:[#allocation2 + $0x7a] sm:$0xff]  ;;  %v2577_v58 = vpack.c.bf16 %v1279_v52, %v1279_v52 }
  0x43   : > { %v2583_v62 = vpack.c.bf16 %v1391_v55, %v1391_v55 }
  0x44   : > { %1322 = vrot.lane.b32.xlu1 %v1289_v43, %s2229_s19 }
  0x45   : > { %1320 = vrot.lane.b32.xlu0 %v1288_v46, %s2229_s19 }
  0x46   : > { %1433 = vrot.lane.b32.xlu2 %v1401_v47, %s2230_s20 }
  0x4c   : > { %645 = vrot.lane.b32.xlu1 %v2370_v17, %s2228_s18 }
  0x4d   : > { %1435 = vrot.lane.b32.xlu0 %v1402_v51, %s2230_s20 }
  0x4e   : > { %647 = vrot.lane.b32.xlu2 %v2366_v14, %s2228_s18  ;;  %v1276_v14 = vld [vmem:[#allocation2 + $0x61] sm:$0xff] }
  0x4f   : > { %v2490_v17 = vpack.c.bf16 %v1276_v14, %v1276_v14 }
  0x54   : > { %760 = vrot.lane.b32.xlu1 %v1062_v26, %s2227_s16  ;;  %v1518_v26 = vld [vmem:[%s3040_s3 + $0x10] sm:$0x3] }
  0x55   : > { %758 = vrot.lane.b32.xlu0 %v1061_v33, %s2227_s16  ;;  %v1572_v30 = vunpack.c.l.b16 %v1518_v26  ;;  %v2511_v33 = vpack.c.bf16 %v1165_v32, %v1165_v32  ;;  %v2646_v26 = vld [vmem:[%s2334_s17 + $0x60] sm:$0xff] }
  0x56   : > { %871 = vrot.lane.b32.xlu2 %v2388_v25, %s2224_s11  ;;  %v2501_v25 = vpack.c.bf16 %v1389_v19, %v1389_v19 }
  0x57   : > { %v1575_v34 = vpack.c.b16 %v1572_v30, %v1572_v30  ;;  %587 = vst.msk [vmem:[#allocation3 + $0x28] sm:$0xf] %vm576_vm3, %v2511_v33  ;;  %v498_v30 = vmax.f32 %v2649_v27, 0.0 }
  0x59   : > { %v1605_v35 = vsel %vm1603_vm4, %v1575_v34, 0  ;;  %516 = vst.msk [vmem:[#allocation2 + $0xb1] sm:$0xff] %vm502_vm1, %v498_v30 }
  0x5a   : > { %1612 = vmatpush.bf16.msra.mxu0 %v1605_v35  ;;  %2108 = vmatpush.bf16.msra.mxu3 %v1605_v35 }
  0x5c   : > { %984 = vrot.lane.b32.xlu1 %v1288_v46, %s2223_s9 }
  0x5d   : > { %873 = vrot.lane.b32.xlu0 %v2401_v39, %s2224_s11  ;;  %v2099_v39 = vld [vmem:[%s3040_s3 + $0x8] sm:$0xff] }
  0x5e   : > { %986 = vrot.lane.b32.xlu2 %v1289_v43, %s2223_s9  ;;  %1613 = vmatpush.bf16.msra.mxu0 %v2099_v39 }
  0x5f   : > { %2109 = vmatpush.bf16.msra.mxu3 %v2099_v39 }
  0x60   : > { %v1396_v63 = vld [vmem:[#allocation2 + $0xb2] sm:$0xff] }
  0x62   : > { %1614 = vmatpush.bf16.msra.mxu0 %v2098_v40 }
  0x63   : > { %2110 = vmatpush.bf16.msra.mxu3 %v2098_v40 }
  0x64   : > { %1099 = vrot.lane.b32.xlu1 %v1402_v51, %s2226_s15 }
  0x65   : > { %1097 = vrot.lane.b32.xlu0 %v1401_v47, %s2226_s15 }
  0x66   : > { %1211 = vrot.lane.b32.xlu2 %v1177_v53, %s2225_s13 }
  0x6c   : > { %1324 = vrot.lane.b32.xlu1 %v2430_v57, %s2229_s19 }
  0x6d   : > { %1213 = vrot.lane.b32.xlu0 %v1178_v60, %s2225_s13 }
  0x6e   : > { %1326 = vrot.lane.b32.xlu2 %v2434_v61, %s2229_s19 }
  0x74   : > { %1439 = vrot.lane.b32.xlu1 %v2443_v2, %s2230_s20 }
  0x75   : > { %1437 = vrot.lane.b32.xlu0 %v2445_v3, %s2230_s20 }
  0x76   : > { %649 = vrot.lane.b32.xlu2 %v1288_v46, %s2228_s18 }
  0x7c   : > { %762 = vrot.lane.b32.xlu1 %v1401_v47, %s2227_s16  ;;  %v1166_v47 = vld [vmem:[#allocation2 + $0x80] sm:$0xff] }
  0x7d   : > { %651 = vrot.lane.b32.xlu0 %v1289_v43, %s2228_s18  ;;  %v2556_v48 = vpack.c.bf16 %v1166_v47, %v1166_v47 }
  0x7e   : > { %764 = vrot.lane.b32.xlu2 %v1402_v51, %s2227_s16 }
  0x7f   : > { %588 = vst.msk [vmem:[#allocation3 + $0x2c] sm:$0xf] %vm576_vm3, %v2556_v48 }
  0x80   : > { %v2455_v4 = vpop.permute.xlu2 %867 }
  0x84   : > { %877 = vrot.lane.b32.xlu1 %v1178_v60, %s2224_s11  ;;  %v459_v60 = vld [vmem:[%s2334_s17 + $0x58] sm:$0xff] }
  0x85   : > { %875 = vrot.lane.b32.xlu0 %v1177_v53, %s2224_s11  ;;  %v496_v0 = vmax.f32 %v459_v60, 0.0 }
  0x86   : > { %988 = vrot.lane.b32.xlu2 %v2430_v57, %s2223_s9 }
  0x87   : > { %514 = vst.msk [vmem:[#allocation2 + $0x99] sm:$0xff] %vm502_vm1, %v496_v0 }
  0x88   : > { %v2461_v7 = vpop.permute.xlu2 %869 }
  0x8c   : > { %1101 = vrot.lane.b32.xlu1 %v2445_v3, %s2226_s15 }
  0x8d   : > { %990 = vrot.lane.b32.xlu0 %v2434_v61, %s2223_s9 }
  0x8e   : > { %1103 = vrot.lane.b32.xlu2 %v2443_v2, %s2226_s15  ;;  %v1281_v22 = vld [vmem:[#allocation2 + $0x99] sm:$0xff] }
  0x8f   : > { %v1394_v31 = vld [vmem:[#allocation2 + $0x9a] sm:$0xff] }
  0x90   : > { %v1094_v15 = vpop.permute.xlu2 %1093 }
  0x94   : > { %1217 = vrot.lane.b32.xlu1 %v2482_v13, %s2225_s13 }
  0x95   : > { %1215 = vrot.lane.b32.xlu0 %v2474_v10, %s2225_s13 }
  0x96   : > { %1328 = vrot.lane.b32.xlu2 %v2490_v17, %s2229_s19  ;;  %v983_v20 = vpop.permute.xlu1 %982 }
  0x97   : > { %v981_v23 = vpop.permute.xlu0 %980 }
  0x98   : > { %v2499_v24 = vpop.permute.xlu2 %1209 }
  0x9c   : > { %1441 = vrot.lane.b32.xlu1 %v2501_v25, %s2230_s20 }
  0x9d   : > { %1330 = vrot.lane.b32.xlu0 %v2507_v28, %s2229_s19 }
  0x9e   : > { %1443 = vrot.lane.b32.xlu2 %v2509_v29, %s2230_s20  ;;  %v1208_v36 = vpop.permute.xlu1 %1207 }
  0x9f   : > { %v1096_v37 = vpop.permute.xlu0 %1095 }
  0xa0   : > { %v1434_v38 = vpop.permute.xlu2 %1433 }
  0xa4   : > { %655 = vrot.lane.b32.xlu1 %v2434_v61, %s2228_s18  ;;  %v2581_v61 = vpack.c.bf16 %v1278_v54, %v1278_v54 }
  0xa5   : > { %653 = vrot.lane.b32.xlu0 %v2430_v57, %s2228_s18 }
  0xa6   : > { %766 = vrot.lane.b32.xlu2 %v2445_v3, %s2227_s16  ;;  %v755_v41 = vpop.permute.xlu1 %754 }
  0xa7   : > { %v642_v42 = vpop.permute.xlu0 %641 }
  0xa8   : > { %v648_v43 = vpop.permute.xlu2 %647  ;;  %690 = vst.msk [vmem:[#allocation3] sm:$0xf] %vm689_vm5, %v642_v42 }
  0xa9   : > { %803 = vst.msk [vmem:[#allocation3] sm:$0xf] %vm802_vm6, %v755_v41 }
  0xaa   : > { %916 = vst.msk [vmem:[#allocation3] sm:$0xf] %vm915_vm7, %v2455_v4 }
  0xab   : > { %1029 = vst.msk [vmem:[#allocation3] sm:$0xf] %vm1028_vm8, %v981_v23 }
  0xac   : > { %1142 = vst.msk [vmem:[#allocation3] sm:$0xf] %vm1141_vm9, %v1094_v15  ;;  %879 = vrot.lane.b32.xlu1 %v2474_v10, %s2224_s11  ;;  %v1167_v15 = vld [vmem:[#allocation2 + $0x90] sm:$0xff] }
  0xad   : > { %768 = vrot.lane.b32.xlu0 %v2443_v2, %s2227_s16  ;;  %1256 = vst.msk [vmem:[#allocation3] sm:$0xf] %vm1255_vm10, %v1208_v36  ;;  %v1392_v2 = vld [vmem:[#allocation2 + $0x82] sm:$0xff]  ;;  %v2624_v16 = vpack.c.bf16 %v1167_v15, %v1167_v15 }
  0xae   : > { %881 = vrot.lane.b32.xlu2 %v2482_v13, %s2224_s11  ;;  %v757_v44 = vpop.permute.xlu1 %756  ;;  %693 = vst.msk [vmem:[#allocation3 + $0xc] sm:$0xf] %vm689_vm5, %v648_v43  ;;  %v2597_v6 = vpack.c.bf16 %v1392_v2, %v1392_v2 }
  0xaf   : > { %v644_v45 = vpop.permute.xlu0 %643  ;;  %589 = vst.msk [vmem:[#allocation3 + $0x30] sm:$0xf] %vm576_vm3, %v2624_v16 }
  0xb0   : > { %v872_v46 = vpop.permute.xlu2 %871  ;;  %691 = vst.msk [vmem:[#allocation3 + $0x4] sm:$0xf] %vm689_vm5, %v644_v45 }
  0xb1   : > { %804 = vst.msk [vmem:[#allocation3 + $0x4] sm:$0xf] %vm802_vm6, %v757_v44 }
  0xb2   : > { %917 = vst.msk [vmem:[#allocation3 + $0x4] sm:$0xf] %vm915_vm7, %v2461_v7  ;;  %v1168_v7 = vld [vmem:[#allocation2 + $0x98] sm:$0xff] }
  0xb3   : > { %1030 = vst.msk [vmem:[#allocation3 + $0x4] sm:$0xf] %vm1028_vm8, %v983_v20  ;;  %v2601_v8 = vpack.c.bf16 %v1168_v7, %v1168_v7  ;;  %v1280_v20 = vld [vmem:[#allocation2 + $0x91] sm:$0xff]  ;;  %v2744_v7 = vpack.c.bf16 %v1396_v63, %v1396_v63 }
  0xb4   : > { %1143 = vst.msk [vmem:[#allocation3 + $0x4] sm:$0xf] %vm1141_vm9, %v1096_v37  ;;  %994 = vrot.lane.b32.xlu1 %v2507_v28, %s2223_s9  ;;  %v2665_v37 = vpack.c.bf16 %v1394_v31, %v1394_v31 }
  0xb5   : > { %1257 = vst.msk [vmem:[#allocation3 + $0x4] sm:$0xf] %vm1255_vm10, %v2499_v24  ;;  %992 = vrot.lane.b32.xlu0 %v2490_v17, %s2223_s9 }
  0xb6   : > { %1105 = vrot.lane.b32.xlu2 %v2501_v25, %s2226_s15  ;;  %v1323_v49 = vpop.permute.xlu1 %1322  ;;  %590 = vst.msk [vmem:[#allocation3 + $0x34] sm:$0xf] %vm576_vm3, %v2601_v8 }
  0xb7   : > { %1370 = vst.msk [vmem:[#allocation3 + $0x4] sm:$0xf] %vm1368_vm11, %v1323_v49  ;;  %v1321_v50 = vpop.permute.xlu0 %1320 }
  0xb8   : > { %v987_v51 = vpop.permute.xlu2 %986  ;;  %1369 = vst.msk [vmem:[#allocation3] sm:$0xf] %vm1368_vm11, %v1321_v50 }
  0xb9   : > { %1482 = vst.msk [vmem:[#allocation3] sm:$0xf] %vm1481_vm12, %v1434_v38 }
  0xbc   : > { %1219 = vrot.lane.b32.xlu1 %v2511_v33, %s2225_s13 }
  0xbd   : > { %1107 = vrot.lane.b32.xlu0 %v2509_v29, %s2226_s15 }
  0xbe   : > { %1221 = vrot.lane.b32.xlu2 %v2556_v48, %s2225_s13  ;;  %v646_v53 = vpop.permute.xlu1 %645 }
  0xbf   : > { %v1436_v56 = vpop.permute.xlu0 %1435  ;;  %692 = vst.msk [vmem:[#allocation3 + $0x8] sm:$0xf] %vm689_vm5, %v646_v53 }
  0xc0   : > { %v1212_v57 = vpop.permute.xlu2 %1211  ;;  %1483 = vst.msk [vmem:[#allocation3 + $0x4] sm:$0xf] %vm1481_vm12, %v1436_v56  ;;  %v2715_v56 = vld [vmem:[%s2334_s17 + $0x70] sm:$0xff] }
  0xc4   : > { %1334 = vrot.lane.b32.xlu1 %v2577_v58, %s2229_s19 }
  0xc5   : > { %1332 = vrot.lane.b32.xlu0 %v2581_v61, %s2229_s19 }
  0xc6   : > { %1445 = vrot.lane.b32.xlu2 %v2583_v62, %s2230_s20  ;;  %v761_v1 = vpop.permute.xlu1 %760 }
  0xc7   : > { %v759_v3 = vpop.permute.xlu0 %758  ;;  %806 = vst.msk [vmem:[#allocation3 + $0xc] sm:$0xf] %vm802_vm6, %v761_v1  ;;  %v2090_v4 = vld [vmem:[#allocation3] sm:$0xff] }
  0xc8   : > { %v1327_v5 = vpop.permute.xlu2 %1326  ;;  %805 = vst.msk [vmem:[#allocation3 + $0x8] sm:$0xf] %vm802_vm6, %v759_v3  ;;  %2046 = vmatmul.msk.bf16.vlgmr.msra.gmra.mxu0 %vm1578_vm13, %v2090_v4  ;;  %v2106_v4 = vld [vmem:[%s3042_s5 + $0x30] sm:$0xff] }
  0xc9   : > { %918 = vst.msk [vmem:[#allocation3 + $0x8] sm:$0xf] %vm915_vm7, %v872_v46  ;;  %1749 = vmatpush.bf16.msra.mxu1 %v2106_v4  ;;  %2112 = vmatpush.bf16.msra.mxu2 %v2106_v4 }
  0xcc   : > { %657 = vrot.lane.b32.xlu1 %v2490_v17, %s2228_s18 }
  0xcd   : > { %1447 = vrot.lane.b32.xlu0 %v2597_v6, %s2230_s20 }
  0xce   : > { %659 = vrot.lane.b32.xlu2 %v2507_v28, %s2228_s18  ;;  %v985_v9 = vpop.permute.xlu1 %984  ;;  %v2651_v28 = vpack.c.bf16 %v1281_v22, %v1281_v22 }
  0xcf   : > { %v874_v10 = vpop.permute.xlu0 %873  ;;  %1031 = vst.msk [vmem:[#allocation3 + $0x8] sm:$0xf] %vm1028_vm8, %v985_v9  ;;  %v2105_v9 = vld [vmem:[%s3042_s5 + $0x28] sm:$0xff] }
  0xd0   : > { %v650_v11 = vpop.permute.xlu2 %649  ;;  %919 = vst.msk [vmem:[#allocation3 + $0xc] sm:$0xf] %vm915_vm7, %v874_v10  ;;  %1750 = vmatpush.bf16.msra.mxu1 %v2105_v9  ;;  %2113 = vmatpush.bf16.msra.mxu2 %v2105_v9 }
  0xd1   : > { %1032 = vst.msk [vmem:[#allocation3 + $0xc] sm:$0xf] %vm1028_vm8, %v987_v51 }
  0xd2   : > { %694 = vst.msk [vmem:[#allocation3 + $0x10] sm:$0xf] %vm689_vm5, %v650_v11 }
  0xd4   : > { %772 = vrot.lane.b32.xlu1 %v2509_v29, %s2227_s16  ;;  %v497_v29 = vmax.f32 %v2646_v26, 0.0 }
  0xd5   : > { %770 = vrot.lane.b32.xlu0 %v2501_v25, %s2227_s16  ;;  %v2643_v25 = vpack.c.bf16 %v1280_v20, %v1280_v20 }
  0xd6   : > { %883 = vrot.lane.b32.xlu2 %v2511_v33, %s2224_s11  ;;  %v1100_v12 = vpop.permute.xlu1 %1099  ;;  %515 = vst.msk [vmem:[#allocation2 + $0xa9] sm:$0xff] %vm502_vm1, %v497_v29  ;;  %v1393_v33 = vld [vmem:[#allocation2 + $0x92] sm:$0xff] }
  0xd7   : > { %v1098_v13 = vpop.permute.xlu0 %1097  ;;  %1145 = vst.msk [vmem:[#allocation3 + $0xc] sm:$0xf] %vm1141_vm9, %v1100_v12  ;;  %v2669_v38 = vpack.c.bf16 %v1393_v33, %v1393_v33 }
  0xd8   : > { %v765_v14 = vpop.permute.xlu2 %764  ;;  %1144 = vst.msk [vmem:[#allocation3 + $0x8] sm:$0xf] %vm1141_vm9, %v1098_v13  ;;  %v2104_v13 = vld [vmem:[%s3042_s5 + $0x20] sm:$0xff] }
  0xd9   : > { %1258 = vst.msk [vmem:[#allocation3 + $0x8] sm:$0xf] %vm1255_vm10, %v1212_v57  ;;  %1751 = vmatpush.bf16.msra.mxu1 %v2104_v13  ;;  %2114 = vmatpush.bf16.msra.mxu2 %v2104_v13 }
  0xdc   : > { %996 = vrot.lane.b32.xlu1 %v2581_v61, %s2223_s9 }
  0xdd   : > { %885 = vrot.lane.b32.xlu0 %v2556_v48, %s2224_s11  ;;  %v1169_v39 = vld [vmem:[#allocation2 + $0xa8] sm:$0xff]  ;;  %v1170_v41 = vld [vmem:[#allocation2 + $0xb0] sm:$0xff] }
  0xde   : > { %998 = vrot.lane.b32.xlu2 %v2577_v58, %s2223_s9  ;;  %v1325_v17 = vpop.permute.xlu1 %1324  ;;  %v2671_v40 = vpack.c.bf16 %v1169_v39, %v1169_v39  ;;  %v2675_v42 = vpack.c.bf16 %v1170_v41, %v1170_v41  ;;  %v1282_v53 = vld [vmem:[#allocation2 + $0xa9] sm:$0xff] }
  0xdf   : > { %v1214_v18 = vpop.permute.xlu0 %1213  ;;  %1371 = vst.msk [vmem:[#allocation3 + $0x8] sm:$0xf] %vm1368_vm11, %v1325_v17  ;;  %v2718_v57 = vpack.c.bf16 %v1282_v53, %v1282_v53  ;;  %v1395_v60 = vld [vmem:[#allocation2 + $0xaa] sm:$0xff] }
  0xe0   : > { %v989_v19 = vpop.permute.xlu2 %988  ;;  %1259 = vst.msk [vmem:[#allocation3 + $0xc] sm:$0xf] %vm1255_vm10, %v1214_v18  ;;  %v2733_v3 = vpack.c.bf16 %v1395_v60, %v1395_v60  ;;  %v2102_v18 = vld [vmem:[%s3042_s5 + $0x10] sm:$0xff]  ;;  %v531_v39 = vld [vmem:[%s431_s10 + $0x8] sm:$0xff] }
  0xe1   : > { %1372 = vst.msk [vmem:[#allocation3 + $0xc] sm:$0xf] %vm1368_vm11, %v1327_v5  ;;  %v2739_v5 = vld [vmem:[%s2334_s17 + $0x78] sm:$0xff] }
  0xe2   : > { %591 = vst.msk [vmem:[#allocation3 + $0x38] sm:$0xf] %vm576_vm3, %v2671_v40 }
  0xe3   : > { %592 = vst.msk [vmem:[#allocation3 + $0x3c] sm:$0xf] %vm576_vm3, %v2675_v42 }
  0xe4   : > { %1111 = vrot.lane.b32.xlu1 %v2597_v6, %s2226_s15 }
  0xe5   : > { %1109 = vrot.lane.b32.xlu0 %v2583_v62, %s2226_s15 }
  0xe6   : > { %1223 = vrot.lane.b32.xlu2 %v2624_v16, %s2225_s13  ;;  %v1440_v21 = vpop.permute.xlu1 %1439 }
  0xe7   : > { %v1438_v23 = vpop.permute.xlu0 %1437  ;;  %1485 = vst.msk [vmem:[#allocation3 + $0xc] sm:$0xf] %vm1481_vm12, %v1440_v21 }
  0xe8   : > { %v1104_v24 = vpop.permute.xlu2 %1103  ;;  %1484 = vst.msk [vmem:[#allocation3 + $0x8] sm:$0xf] %vm1481_vm12, %v1438_v23  ;;  %v2100_v23 = vld [vmem:[%s3042_s5] sm:$0xff] }
  0xec   : > { %1336 = vrot.lane.b32.xlu1 %v2643_v25, %s2229_s19 }
  0xed   : > { %1225 = vrot.lane.b32.xlu0 %v2601_v8, %s2225_s13 }
  0xee   : > { %1338 = vrot.lane.b32.xlu2 %v2651_v28, %s2229_s19  ;;  %v763_v32 = vpop.permute.xlu1 %762 }
  0xef   : > { %v652_v34 = vpop.permute.xlu0 %651  ;;  %807 = vst.msk [vmem:[#allocation3 + $0x10] sm:$0xf] %vm802_vm6, %v763_v32  ;;  %v2091_v35 = vld [vmem:[#allocation3 + $0x8] sm:$0xff] }
  0xf0   : > { %v1329_v36 = vpop.permute.xlu2 %1328  ;;  %695 = vst.msk [vmem:[#allocation3 + $0x14] sm:$0xf] %vm689_vm5, %v652_v34  ;;  %2047 = vmatmul.msk.bf16.gmra.mxu0 %vm1578_vm13, %v2091_v35 }
  0xf1   : > { %808 = vst.msk [vmem:[#allocation3 + $0x14] sm:$0xf] %vm802_vm6, %v765_v14  ;;  %v2103_v14 = vld [vmem:[%s3042_s5 + $0x18] sm:$0xff] }
  0xf2   : > { %1752 = vmatpush.bf16.msra.mxu1 %v2103_v14  ;;  %2115 = vmatpush.bf16.msra.mxu2 %v2103_v14 }
  0xf4   : > { %1451 = vrot.lane.b32.xlu1 %v2665_v37, %s2230_s20 }
  0xf5   : > { %1449 = vrot.lane.b32.xlu0 %v2669_v38, %s2230_s20 }
  0xf6   : > { %661 = vrot.lane.b32.xlu2 %v2581_v61, %s2228_s18  ;;  %v878_v43 = vpop.permute.xlu1 %877  ;;  %1753 = vmatpush.bf16.msra.mxu1 %v2102_v18 }
  0xf7   : > { %v876_v44 = vpop.permute.xlu0 %875  ;;  %921 = vst.msk [vmem:[#allocation3 + $0x14] sm:$0xf] %vm915_vm7, %v878_v43  ;;  %2116 = vmatpush.bf16.msra.mxu2 %v2102_v18  ;;  %v535_v43 = vstv %s534_s14 }
  0xf8   : > { %v1444_v45 = vpop.permute.xlu2 %1443  ;;  %920 = vst.msk [vmem:[#allocation3 + $0x10] sm:$0xf] %vm915_vm7, %v876_v44  ;;  %vm536_vm14 = vcmp.eq.s32.totalorder %v535_v43, 1 }
  0xf9   : > { %1033 = vst.msk [vmem:[#allocation3 + $0x10] sm:$0xf] %vm1028_vm8, %v989_v19  ;;  %v2101_v19 = vld [vmem:[%s3042_s5 + $0x8] sm:$0xff] }
  0xfa   : > { %1754 = vmatpush.bf16.msra.mxu1 %v2101_v19 }
  0xfb   : > { %2117 = vmatpush.bf16.msra.mxu2 %v2101_v19 }
  0xfc   : > { %774 = vrot.lane.b32.xlu1 %v2583_v62, %s2227_s16  ;;  %v1283_v62 = vld [vmem:[#allocation2 + $0xb1] sm:$0xff] }
  0xfd   : > { %663 = vrot.lane.b32.xlu0 %v2577_v58, %s2228_s18  ;;  %v499_v58 = vmax.f32 %v2715_v56, 0.0 }
  0xfe   : > { %776 = vrot.lane.b32.xlu2 %v2597_v6, %s2227_s16  ;;  %v1102_v46 = vpop.permute.xlu1 %1101  ;;  %v2742_v6 = vpack.c.bf16 %v1283_v62, %v1283_v62  ;;  %1755 = vmatpush.bf16.msra.mxu1 %v2100_v23 }
  0xff   : > { %v991_v47 = vpop.permute.xlu0 %990  ;;  %1146 = vst.msk [vmem:[#allocation3 + $0x10] sm:$0xf] %vm1141_vm9, %v1102_v46  ;;  %2118 = vmatpush.bf16.msra.mxu2 %v2100_v23 }
 0x100   : > { %v767_v48 = vpop.permute.xlu2 %766  ;;  %1034 = vst.msk [vmem:[#allocation3 + $0x14] sm:$0xf] %vm1028_vm8, %v991_v47 }
 0x101   : > { %1147 = vst.msk [vmem:[#allocation3 + $0x14] sm:$0xf] %vm1141_vm9, %v1104_v24 }
 0x102   : > { %517 = vst.msk [vmem:[#allocation2 + $0xc1] sm:$0xff] %vm502_vm1, %v499_v58 }
 0x104   : > { %889 = vrot.lane.b32.xlu1 %v2601_v8, %s2224_s11  ;;  %v500_v8 = vmax.f32 %v2739_v5, 0.0 }
 0x105   : > { %887 = vrot.lane.b32.xlu0 %v2624_v16, %s2224_s11 }
 0x106   : > { %1000 = vrot.lane.b32.xlu2 %v2643_v25, %s2223_s9  ;;  %v1218_v49 = vpop.permute.xlu1 %1217  ;;  %518 = vst.msk [vmem:[#allocation2 + $0xc9] sm:$0xff] %vm502_vm1, %v500_v8 }
 0x107   : > { %v1216_v50 = vpop.permute.xlu0 %1215  ;;  %1261 = vst.msk [vmem:[#allocation3 + $0x14] sm:$0xf] %vm1255_vm10, %v1218_v49 }
 0x108   : > { %v882_v51 = vpop.permute.xlu2 %881  ;;  %1260 = vst.msk [vmem:[#allocation3 + $0x10] sm:$0xf] %vm1255_vm10, %v1216_v50 }
 0x109   : > { %1373 = vst.msk [vmem:[#allocation3 + $0x10] sm:$0xf] %vm1368_vm11, %v1329_v36  ;;  %v1171_v24 = vld [vmem:[#allocation2 + $0xc0] sm:$0xff] }
 0x10a   : > { %v2813_v30 = vpack.c.bf16 %v1171_v24, %v1171_v24  ;;  %v1284_v35 = vld [vmem:[#allocation2 + $0xc1] sm:$0xff] }
 0x10b   : > { %v1300_v44 = vpack.c.bf16 %v1284_v35, %v1284_v35 }
 0x10c   : > { %1113 = vrot.lane.b32.xlu1 %v2669_v38, %s2226_s15 }
 0x10d   : > { %1002 = vrot.lane.b32.xlu0 %v2651_v28, %s2223_s9  ;;  %v1172_v31 = vld [vmem:[#allocation2 + $0xc8] sm:$0xff] }
 0x10e   : > { %1115 = vrot.lane.b32.xlu2 %v2665_v37, %s2226_s15  ;;  %v1442_v52 = vpop.permute.xlu1 %1441  ;;  %v2817_v32 = vpack.c.bf16 %v1172_v31, %v1172_v31  ;;  %v1285_v33 = vld [vmem:[#allocation2 + $0xc9] sm:$0xff] }
 0x10f   : > { %v1331_v54 = vpop.permute.xlu0 %1330  ;;  %1486 = vst.msk [vmem:[#allocation3 + $0x10] sm:$0xf] %vm1481_vm12, %v1442_v52 }
 0x110   : > { %v1106_v55 = vpop.permute.xlu2 %1105  ;;  %1374 = vst.msk [vmem:[#allocation3 + $0x14] sm:$0xf] %vm1368_vm11, %v1331_v54 }
 0x111   : > { %1487 = vst.msk [vmem:[#allocation3 + $0x14] sm:$0xf] %vm1481_vm12, %v1444_v45  ;;  %v1397_v45 = vld [vmem:[#allocation2 + $0xc2] sm:$0xff] }
 0x112   : > { %v1413_v46 = vpack.c.bf16 %v1397_v45, %v1397_v45 }
 0x114   : > { %1229 = vrot.lane.b32.xlu1 %v2675_v42, %s2225_s13 }
 0x115   : > { %1227 = vrot.lane.b32.xlu0 %v2671_v40, %s2225_s13 }
 0x116   : > { %1340 = vrot.lane.b32.xlu2 %v2718_v57, %s2229_s19  ;;  %v656_v61 = vpop.permute.xlu1 %655 }
 0x117   : > { %v654_v0 = vpop.permute.xlu0 %653  ;;  %697 = vst.msk [vmem:[#allocation3 + $0x1c] sm:$0xf] %vm689_vm5, %v656_v61 }
 0x118   : > { %v1222_v1 = vpop.permute.xlu2 %1221  ;;  %696 = vst.msk [vmem:[#allocation3 + $0x18] sm:$0xf] %vm689_vm5, %v654_v0  ;;  %v2092_v2 = vld [vmem:[#allocation3 + $0x10] sm:$0xff] }
 0x119   : > { %809 = vst.msk [vmem:[#allocation3 + $0x18] sm:$0xf] %vm802_vm6, %v767_v48  ;;  %2048 = vmatmul.msk.bf16.gmra.mxu0 %vm1578_vm13, %v2092_v2 }
 0x11c   : > { %1453 = vrot.lane.b32.xlu1 %v2733_v3, %s2230_s20 }
 0x11d   : > { %1342 = vrot.lane.b32.xlu0 %v2742_v6, %s2229_s19 }
 0x11e   : > { %1455 = vrot.lane.b32.xlu2 %v2744_v7, %s2230_s20  ;;  %v880_v10 = vpop.permute.xlu1 %879 }
 0x11f   : > { %v769_v11 = vpop.permute.xlu0 %768  ;;  %922 = vst.msk [vmem:[#allocation3 + $0x18] sm:$0xf] %vm915_vm7, %v880_v10 }
 0x120   : > { %v1446_v12 = vpop.permute.xlu2 %1445  ;;  %810 = vst.msk [vmem:[#allocation3 + $0x1c] sm:$0xf] %vm802_vm6, %v769_v11 }
 0x121   : > { %923 = vst.msk [vmem:[#allocation3 + $0x1c] sm:$0xf] %vm915_vm7, %v882_v51  ;;  %v1398_v51 = vld [vmem:[#allocation2 + $0xca] sm:$0xff] }
 0x122   : > { %v1414_v58 = vpack.c.bf16 %v1398_v51, %v1398_v51 }
 0x124   : > { %667 = vrot.lane.b32.xlu1 %v2651_v28, %s2228_s18 }
 0x125   : > { %665 = vrot.lane.b32.xlu0 %v2643_v25, %s2228_s18 }
 0x126   : > { %778 = vrot.lane.b32.xlu2 %v2669_v38, %s2227_s16  ;;  %v995_v15 = vpop.permute.xlu1 %994  ;;  %v530_v38 = vld [vmem:[%s431_s10] sm:$0xff] }
 0x127   : > { %v993_v16 = vpop.permute.xlu0 %992  ;;  %1036 = vst.msk [vmem:[#allocation3 + $0x1c] sm:$0xf] %vm1028_vm8, %v995_v15  ;;  %v532_v41 = vmax.f32 %v530_v38, 0.0 }
 0x128   : > { %v660_v17 = vpop.permute.xlu2 %659  ;;  %1035 = vst.msk [vmem:[#allocation3 + $0x18] sm:$0xf] %vm1028_vm8, %v993_v16 }
 0x129   : > { %1148 = vst.msk [vmem:[#allocation3 + $0x18] sm:$0xf] %vm1141_vm9, %v1106_v55  ;;  %v537_v47 = vsel %vm536_vm14, %v532_v41, 0.0  ;;  %v2840_v55 = vld [vmem:[%s3041_s4] ss:$0 sm:$0xff] }
 0x12a   : > { %699 = vst.msk [vmem:[#allocation3 + $0x24] sm:$0xf] %vm689_vm5, %v660_v17 }
 0x12b   : > { %542 = vst.msk [vmem:[#allocation2 + $0xd9] sm:$0xff] %vm502_vm1, %v537_v47 }
 0x12c   : > { %891 = vrot.lane.b32.xlu1 %v2671_v40, %s2224_s11  ;;  %v1301_v40 = vpack.c.bf16 %v1285_v33, %v1285_v33 }
 0x12d   : > { %780 = vrot.lane.b32.xlu0 %v2665_v37, %s2227_s16 }
 0x12e   : > { %893 = vrot.lane.b32.xlu2 %v2675_v42, %s2224_s11  ;;  %v1220_v20 = vpop.permute.xlu1 %1219  ;;  %v533_v42 = vmax.f32 %v531_v39, 0.0 }
 0x12f   : > { %v1108_v21 = vpop.permute.xlu0 %1107  ;;  %1262 = vst.msk [vmem:[#allocation3 + $0x18] sm:$0xf] %vm1255_vm10, %v1220_v20 }
 0x130   : > { %v884_v22 = vpop.permute.xlu2 %883  ;;  %1149 = vst.msk [vmem:[#allocation3 + $0x1c] sm:$0xf] %vm1141_vm9, %v1108_v21  ;;  %v538_v48 = vsel %vm536_vm14, %v533_v42, 0.0 }
 0x131   : > { %1263 = vst.msk [vmem:[#allocation3 + $0x1c] sm:$0xf] %vm1255_vm10, %v1222_v1 }
 0x132   : > { %543 = vst.msk [vmem:[#allocation2 + $0xe1] sm:$0xff] %vm502_vm1, %v538_v48  ;;  %v1173_v10 = vld [vmem:[#allocation2 + $0xd8] sm:$0xff] }
 0x133   : > { %v1189_v11 = vpack.c.bf16 %v1173_v10, %v1173_v10 }
 0x134   : > { %1006 = vrot.lane.b32.xlu1 %v2742_v6, %s2223_s9 }
 0x135   : > { %1004 = vrot.lane.b32.xlu0 %v2718_v57, %s2223_s9 }
 0x136   : > { %1117 = vrot.lane.b32.xlu2 %v2733_v3, %s2226_s15  ;;  %v1335_v25 = vpop.permute.xlu1 %1334 }
 0x137   : > { %v1333_v28 = vpop.permute.xlu0 %1332  ;;  %1376 = vst.msk [vmem:[#allocation3 + $0x1c] sm:$0xf] %vm1368_vm11, %v1335_v25 }
 0x138   : > { %v999_v29 = vpop.permute.xlu2 %998  ;;  %1375 = vst.msk [vmem:[#allocation3 + $0x18] sm:$0xf] %vm1368_vm11, %v1333_v28 }
 0x139   : > { %1488 = vst.msk [vmem:[#allocation3 + $0x18] sm:$0xf] %vm1481_vm12, %v1446_v12  ;;  %v1286_v12 = vld [vmem:[#allocation2 + $0xd9] sm:$0xff]  ;;  %v1287_v19 = vld [vmem:[#allocation2 + $0xe1] sm:$0xff] }
 0x13a   : > { %v1174_v14 = vld [vmem:[#allocation2 + $0xe0] sm:$0xff]  ;;  %v1302_v17 = vpack.c.bf16 %v1286_v12, %v1286_v12  ;;  %v1303_v20 = vpack.c.bf16 %v1287_v19, %v1287_v19 }
 0x13b   : > { %v1190_v18 = vpack.c.bf16 %v1174_v14, %v1174_v14  ;;  %v1400_v21 = vld [vmem:[#allocation2 + $0xe2] sm:$0xff]  ;;  %v1399_v24 = vld [vmem:[#allocation2 + $0xda] sm:$0xff] }
 0x13c   : > { %1231 = vrot.lane.b32.xlu1 %v2813_v30, %s2225_s13  ;;  %v1415_v31 = vpack.c.bf16 %v1399_v24, %v1399_v24 }
 0x13d   : > { %1119 = vrot.lane.b32.xlu0 %v2744_v7, %s2226_s15 }
 0x13e   : > { %1233 = vrot.lane.b32.xlu2 %v2817_v32, %s2225_s13  ;;  %v658_v34 = vpop.permute.xlu1 %657 }
 0x13f   : > { %v1448_v36 = vpop.permute.xlu0 %1447  ;;  %698 = vst.msk [vmem:[#allocation3 + $0x20] sm:$0xf] %vm689_vm5, %v658_v34 }
 0x140   : > { %v1224_v37 = vpop.permute.xlu2 %1223  ;;  %1489 = vst.msk [vmem:[#allocation3 + $0x1c] sm:$0xf] %vm1481_vm12, %v1448_v36 }
 0x144   : > { %1346 = vrot.lane.b32.xlu1 %v1301_v40, %s2229_s19 }
 0x145   : > { %1344 = vrot.lane.b32.xlu0 %v1300_v44, %s2229_s19  ;;  %v1616_v49 = vpop.f32.mrf.mxu0 }
 0x146   : > { %1457 = vrot.lane.b32.xlu2 %v1413_v46, %s2230_s20  ;;  %v773_v50 = vpop.permute.xlu1 %772  ;;  %v1617_v59 = vadd.f32 %v2840_v55, %v1616_v49 }
 0x147   : > { %v771_v52 = vpop.permute.xlu0 %770  ;;  %812 = vst.msk [vmem:[#allocation3 + $0x24] sm:$0xf] %vm802_vm6, %v773_v50  ;;  %v2093_v53 = vld [vmem:[#allocation3 + $0x18] sm:$0xff] }
 0x148   : > { %v1339_v54 = vpop.permute.xlu2 %1338  ;;  %811 = vst.msk [vmem:[#allocation3 + $0x20] sm:$0xf] %vm802_vm6, %v771_v52  ;;  %2049 = vmatmul.msk.bf16.gmra.mxu0 %vm1578_vm13, %v2093_v53  ;;  %v1656_v1 = vmax.f32 %v1617_v59, 0.0 }
 0x149   : > { %924 = vst.msk [vmem:[#allocation3 + $0x20] sm:$0xf] %vm915_vm7, %v884_v22 }
 0x14c   : > { %669 = vrot.lane.b32.xlu1 %v2718_v57, %s2228_s18 }
 0x14d   : > { %1459 = vrot.lane.b32.xlu0 %v1414_v58, %s2230_s20  ;;  %v1618_v60 = vpop.f32.mrf.mxu0 }
 0x14e   : > { %671 = vrot.lane.b32.xlu2 %v2742_v6, %s2228_s18  ;;  %v997_v61 = vpop.permute.xlu1 %996  ;;  %v1619_v62 = vadd.f32 %v2840_v55, %v1618_v60 }
 0x14f   : > { %v886_v63 = vpop.permute.xlu0 %885  ;;  %1037 = vst.msk [vmem:[#allocation3 + $0x20] sm:$0xf] %vm1028_vm8, %v997_v61 }
 0x150   : > { %v662_v0 = vpop.permute.xlu2 %661  ;;  %925 = vst.msk [vmem:[#allocation3 + $0x24] sm:$0xf] %vm915_vm7, %v886_v63  ;;  %v1657_v2 = vmax.f32 %v1619_v62, 0.0 }
 0x151   : > { %1038 = vst.msk [vmem:[#allocation3 + $0x24] sm:$0xf] %vm1028_vm8, %v999_v29 }
 0x152   : > { %700 = vst.msk [vmem:[#allocation3 + $0x28] sm:$0xf] %vm689_vm5, %v662_v0  ;;  %v1672_v57 = vpack.c.bf16 %v1657_v2, %v1656_v1 }
 0x154   : > { %784 = vrot.lane.b32.xlu1 %v2744_v7, %s2227_s16  ;;  %1756 = vmatmul.bf16.vlgmr.msra.gmra.mxu1 %v1672_v57 }
 0x155   : > { %782 = vrot.lane.b32.xlu0 %v2733_v3, %s2227_s16 }
 0x156   : > { %v1112_v4 = vpop.permute.xlu1 %1111  ;;  %895 = vrot.lane.b32.xlu2 %v2813_v30, %s2224_s11  ;;  %v1416_v30 = vpack.c.bf16 %v1400_v21, %v1400_v21 }
 0x157   : > { %v1110_v6 = vpop.permute.xlu0 %1109  ;;  %1151 = vst.msk [vmem:[#allocation3 + $0x24] sm:$0xf] %vm1141_vm9, %v1112_v4 }
 0x158   : > { %v777_v8 = vpop.permute.xlu2 %776  ;;  %1150 = vst.msk [vmem:[#allocation3 + $0x20] sm:$0xf] %vm1141_vm9, %v1110_v6 }
 0x159   : > { %1264 = vst.msk [vmem:[#allocation3 + $0x20] sm:$0xf] %vm1255_vm10, %v1224_v37 }
 0x15c   : > { %1008 = vrot.lane.b32.xlu1 %v1300_v44, %s2223_s9 }
 0x15d   : > { %897 = vrot.lane.b32.xlu0 %v2817_v32, %s2224_s11 }
 0x15e   : > { %v1337_v7 = vpop.permute.xlu1 %1336  ;;  %1010 = vrot.lane.b32.xlu2 %v1301_v40, %s2223_s9 }
 0x15f   : > { %v1226_v3 = vpop.permute.xlu0 %1225  ;;  %1377 = vst.msk [vmem:[#allocation3 + $0x20] sm:$0xf] %vm1368_vm11, %v1337_v7 }
 0x160   : > { %v1001_v9 = vpop.permute.xlu2 %1000  ;;  %1265 = vst.msk [vmem:[#allocation3 + $0x24] sm:$0xf] %vm1255_vm10, %v1226_v3 }
 0x161   : > { %1378 = vst.msk [vmem:[#allocation3 + $0x24] sm:$0xf] %vm1368_vm11, %v1339_v54 }
 0x164   : > { %1123 = vrot.lane.b32.xlu1 %v1414_v58, %s2226_s15 }
 0x165   : > { %1121 = vrot.lane.b32.xlu0 %v1413_v46, %s2226_s15 }
 0x166   : > { %v1452_v13 = vpop.permute.xlu1 %1451  ;;  %1235 = vrot.lane.b32.xlu2 %v1189_v11, %s2225_s13 }
 0x167   : > { %v1450_v15 = vpop.permute.xlu0 %1449  ;;  %1491 = vst.msk [vmem:[#allocation3 + $0x24] sm:$0xf] %vm1481_vm12, %v1452_v13 }
 0x168   : > { %v1116_v16 = vpop.permute.xlu2 %1115  ;;  %1490 = vst.msk [vmem:[#allocation3 + $0x20] sm:$0xf] %vm1481_vm12, %v1450_v15 }
 0x16c   : > { %1348 = vrot.lane.b32.xlu1 %v1302_v17, %s2229_s19 }
 0x16d   : > { %1237 = vrot.lane.b32.xlu0 %v1190_v18, %s2225_s13  ;;  %v1621_v23 = vpop.f32.mrf.mxu0  ;;  %s3047_s13 = sshll.u32 %s2321_s12, 3 }
 0x16e   : > { %v775_v22 = vpop.permute.xlu1 %774  ;;  %1350 = vrot.lane.b32.xlu2 %v1303_v20, %s2229_s19  ;;  %v1622_v32 = vadd.f32 %v2840_v55, %v1621_v23  ;;  %v2930_v23 = vld [vmem:[%s3043_s6] ss:$0 sm:$0xff]  ;;  %s2940_s18 = scalar_lea.vmem %s3044_s7, %s3047_s13 }
 0x16f   : > { %v664_v25 = vpop.permute.xlu0 %663  ;;  %813 = vst.msk [vmem:[#allocation3 + $0x28] sm:$0xf] %vm802_vm6, %v775_v22  ;;  %v2094_v28 = vld [vmem:[#allocation3 + $0x20] sm:$0xff] }
 0x170   : > { %v1341_v29 = vpop.permute.xlu2 %1340  ;;  %701 = vst.msk [vmem:[#allocation3 + $0x2c] sm:$0xf] %vm689_vm5, %v664_v25  ;;  %2050 = vmatmul.msk.bf16.gmra.mxu0 %vm1578_vm13, %v2094_v28  ;;  %v1658_v38 = vmax.f32 %v1622_v32, 0.0 }
 0x171   : > { %814 = vst.msk [vmem:[#allocation3 + $0x2c] sm:$0xf] %vm802_vm6, %v777_v8 }
 0x174   : > { %1463 = vrot.lane.b32.xlu1 %v1416_v30, %s2230_s20 }
 0x175   : > { %1461 = vrot.lane.b32.xlu0 %v1415_v31, %s2230_s20  ;;  %v1623_v34 = vpop.f32.mrf.mxu0  ;;  %v2170_v31 = vld [vmem:[%s2334_s17] sm:$0xff] }
 0x176   : > { %v890_v33 = vpop.permute.xlu1 %889  ;;  %v1624_v36 = vadd.f32 %v2840_v55, %v1623_v34 }
 0x177   : > { %v888_v35 = vpop.permute.xlu0 %887  ;;  %927 = vst.msk [vmem:[#allocation3 + $0x2c] sm:$0xf] %vm915_vm7, %v890_v33 }
 0x178   : > { %v1456_v37 = vpop.permute.xlu2 %1455  ;;  %926 = vst.msk [vmem:[#allocation3 + $0x28] sm:$0xf] %vm915_vm7, %v888_v35  ;;  %v1659_v39 = vmax.f32 %v1624_v36, 0.0 }
 0x179   : > { %1039 = vst.msk [vmem:[#allocation3 + $0x28] sm:$0xf] %vm1028_vm8, %v1001_v9 }
 0x17a   : > { %v1673_v40 = vpack.c.bf16 %v1659_v39, %v1658_v38  ;;  %v2171_v38 = vld [vmem:[%s2334_s17 + $0x8] sm:$0xff] }
 0x17c   : > { %1761 = vmatmul.bf16.gmra.mxu1 %v1673_v40 }
 0x17e   : > { %v1114_v41 = vpop.permute.xlu1 %1113 }
 0x17f   : > { %v1003_v42 = vpop.permute.xlu0 %1002  ;;  %1152 = vst.msk [vmem:[#allocation3 + $0x28] sm:$0xf] %vm1141_vm9, %v1114_v41 }
 0x180   : > { %v779_v43 = vpop.permute.xlu2 %778  ;;  %1040 = vst.msk [vmem:[#allocation3 + $0x2c] sm:$0xf] %vm1028_vm8, %v1003_v42 }
 0x181   : > { %1153 = vst.msk [vmem:[#allocation3 + $0x2c] sm:$0xf] %vm1141_vm9, %v1116_v16 }
 0x186   : > { %v1230_v44 = vpop.permute.xlu1 %1229 }
 0x187   : > { %v1228_v45 = vpop.permute.xlu0 %1227  ;;  %1267 = vst.msk [vmem:[#allocation3 + $0x2c] sm:$0xf] %vm1255_vm10, %v1230_v44 }
 0x188   : > { %v894_v46 = vpop.permute.xlu2 %893  ;;  %1266 = vst.msk [vmem:[#allocation3 + $0x28] sm:$0xf] %vm1255_vm10, %v1228_v45 }
 0x189   : > { %1379 = vst.msk [vmem:[#allocation3 + $0x28] sm:$0xf] %vm1368_vm11, %v1341_v29 }
 0x18e   : > { %v1454_v47 = vpop.permute.xlu1 %1453 }
 0x18f   : > { %v1343_v48 = vpop.permute.xlu0 %1342  ;;  %1492 = vst.msk [vmem:[#allocation3 + $0x28] sm:$0xf] %vm1481_vm12, %v1454_v47 }
 0x190   : > { %v1118_v49 = vpop.permute.xlu2 %1117  ;;  %1380 = vst.msk [vmem:[#allocation3 + $0x2c] sm:$0xf] %vm1368_vm11, %v1343_v48 }
 0x191   : > { %1493 = vst.msk [vmem:[#allocation3 + $0x2c] sm:$0xf] %vm1481_vm12, %v1456_v37 }
 0x196   : > { %v668_v50 = vpop.permute.xlu1 %667  ;;  %v1626_v52 = vpop.f32.mrf.mxu0 }
 0x197   : > { %v666_v51 = vpop.permute.xlu0 %665  ;;  %703 = vst.msk [vmem:[#allocation3 + $0x34] sm:$0xf] %vm689_vm5, %v668_v50  ;;  %v1627_v58 = vadd.f32 %v2840_v55, %v1626_v52 }
 0x198   : > { %702 = vst.msk [vmem:[#allocation3 + $0x30] sm:$0xf] %vm689_vm5, %v666_v51  ;;  %v2095_v53 = vld [vmem:[#allocation3 + $0x28] sm:$0xff]  ;;  %v1234_v54 = vpop.permute.xlu2 %1233 }
 0x199   : > { %815 = vst.msk [vmem:[#allocation3 + $0x30] sm:$0xf] %vm802_vm6, %v779_v43  ;;  %2051 = vmatmul.msk.bf16.vlgmr.msra.gmra.mxu3 %vm1578_vm13, %v2095_v53  ;;  %v1660_v0 = vmax.f32 %v1627_v58, 0.0  ;;  %v2172_v58 = vld [vmem:[%s2334_s17 + $0x10] sm:$0xff] }
 0x19e   : > { %v892_v59 = vpop.permute.xlu1 %891  ;;  %v1628_v61 = vpop.f32.mrf.mxu0 }
 0x19f   : > { %v781_v60 = vpop.permute.xlu0 %780  ;;  %928 = vst.msk [vmem:[#allocation3 + $0x30] sm:$0xf] %vm915_vm7, %v892_v59  ;;  %v1629_v62 = vadd.f32 %v2840_v55, %v1628_v61 }
 0x1a0   : > { %816 = vst.msk [vmem:[#allocation3 + $0x34] sm:$0xf] %vm802_vm6, %v781_v60  ;;  %v1458_v63 = vpop.permute.xlu2 %1457 }
 0x1a1   : > { %929 = vst.msk [vmem:[#allocation3 + $0x34] sm:$0xf] %vm915_vm7, %v894_v46  ;;  %v1661_v1 = vmax.f32 %v1629_v62, 0.0  ;;  %v2173_v62 = vld [vmem:[%s2334_s17 + $0x18] sm:$0xff] }
 0x1a3   : > { %v1674_v2 = vpack.c.bf16 %v1661_v1, %v1660_v0 }
 0x1a5   : > { %1766 = vmatmul.bf16.gmra.mxu1 %v1674_v2 }
 0x1a6   : > { %v1007_v57 = vpop.permute.xlu1 %1006 }
 0x1a7   : > { %v1005_v4 = vpop.permute.xlu0 %1004  ;;  %1042 = vst.msk [vmem:[#allocation3 + $0x34] sm:$0xf] %vm1028_vm8, %v1007_v57 }
 0x1a8   : > { %1041 = vst.msk [vmem:[#allocation3 + $0x30] sm:$0xf] %vm1028_vm8, %v1005_v4  ;;  %v672_v6 = vpop.permute.xlu2 %671 }
 0x1a9   : > { %1154 = vst.msk [vmem:[#allocation3 + $0x30] sm:$0xf] %vm1141_vm9, %v1118_v49 }
 0x1aa   : > { %705 = vst.msk [vmem:[#allocation3 + $0x3c] sm:$0xf] %vm689_vm5, %v672_v6  ;;  %v2174_v6 = vld [vmem:[%s2334_s17 + $0x20] sm:$0xff] }
 0x1ae   : > { %v1232_v8 = vpop.permute.xlu1 %1231 }
 0x1af   : > { %v1120_v7 = vpop.permute.xlu0 %1119  ;;  %1268 = vst.msk [vmem:[#allocation3 + $0x30] sm:$0xf] %vm1255_vm10, %v1232_v8 }
 0x1b0   : > { %1155 = vst.msk [vmem:[#allocation3 + $0x34] sm:$0xf] %vm1141_vm9, %v1120_v7  ;;  %v896_v12 = vpop.permute.xlu2 %895 }
 0x1b1   : > { %1269 = vst.msk [vmem:[#allocation3 + $0x34] sm:$0xf] %vm1255_vm10, %v1234_v54 }
 0x1b6   : > { %v1347_v3 = vpop.permute.xlu1 %1346 }
 0x1b7   : > { %v1345_v9 = vpop.permute.xlu0 %1344  ;;  %1382 = vst.msk [vmem:[#allocation3 + $0x34] sm:$0xf] %vm1368_vm11, %v1347_v3 }
 0x1b8   : > { %1381 = vst.msk [vmem:[#allocation3 + $0x30] sm:$0xf] %vm1368_vm11, %v1345_v9  ;;  %v1011_v17 = vpop.permute.xlu2 %1010 }
 0x1b9   : > { %1494 = vst.msk [vmem:[#allocation3 + $0x30] sm:$0xf] %vm1481_vm12, %v1458_v63 }
 0x1be   : > { %v670_v10 = vpop.permute.xlu1 %669 }
 0x1bf   : > { %v1460_v11 = vpop.permute.xlu0 %1459  ;;  %704 = vst.msk [vmem:[#allocation3 + $0x38] sm:$0xf] %vm689_vm5, %v670_v10 }
 0x1c0   : > { %1495 = vst.msk [vmem:[#allocation3 + $0x34] sm:$0xf] %vm1481_vm12, %v1460_v11  ;;  %v1236_v33 = vpop.permute.xlu2 %1235 }
 0x1c5   : > { %v1631_v14 = vpop.f32.mrf.mxu0 }
 0x1c6   : > { %v785_v13 = vpop.permute.xlu1 %784  ;;  %v1632_v18 = vadd.f32 %v2840_v55, %v1631_v14 }
 0x1c7   : > { %v783_v15 = vpop.permute.xlu0 %782  ;;  %818 = vst.msk [vmem:[#allocation3 + $0x3c] sm:$0xf] %vm802_vm6, %v785_v13  ;;  %v2096_v16 = vld [vmem:[#allocation3 + $0x30] sm:$0xff]  ;;  %v2175_v13 = vld [vmem:[%s2334_s17 + $0x28] sm:$0xff] }
 0x1c8   : > { %817 = vst.msk [vmem:[#allocation3 + $0x38] sm:$0xf] %vm802_vm6, %v783_v15  ;;  %2052 = vmatmul.msk.bf16.gmra.mxu3 %vm1578_vm13, %v2096_v16  ;;  %v1662_v24 = vmax.f32 %v1632_v18, 0.0  ;;  %v1351_v42 = vpop.permute.xlu2 %1350 }
 0x1c9   : > { %930 = vst.msk [vmem:[#allocation3 + $0x38] sm:$0xf] %vm915_vm7, %v896_v12 }
 0x1cd   : > { %v1633_v20 = vpop.f32.mrf.mxu0 }
 0x1ce   : > { %v1009_v19 = vpop.permute.xlu1 %1008  ;;  %v1634_v22 = vadd.f32 %v2840_v55, %v1633_v20  ;;  %v2176_v20 = vld [vmem:[%s2334_s17 + $0x30] sm:$0xff] }
 0x1cf   : > { %v898_v21 = vpop.permute.xlu0 %897  ;;  %1043 = vst.msk [vmem:[#allocation3 + $0x38] sm:$0xf] %vm1028_vm8, %v1009_v19 }
 0x1d0   : > { %931 = vst.msk [vmem:[#allocation3 + $0x3c] sm:$0xf] %vm915_vm7, %v898_v21  ;;  %v1663_v25 = vmax.f32 %v1634_v22, 0.0 }
 0x1d1   : > { %1044 = vst.msk [vmem:[#allocation3 + $0x3c] sm:$0xf] %vm1028_vm8, %v1011_v17  ;;  %v1757_v28 = vpop.f32.mrf.mxu1 }
 0x1d2   : > { %v1758_v29 = vadd.f32 %v2930_v23, %v1757_v28  ;;  %v1675_v30 = vpack.c.bf16 %v1663_v25, %v1662_v24 }
 0x1d4   : > { %v1797_v32 = vadd.f32 %v2170_v31, %v1758_v29  ;;  %1771 = vmatmul.bf16.gmra.mxu1 %v1675_v30  ;;  %v2177_v31 = vld [vmem:[%s2334_s17 + $0x38] sm:$0xff] }
 0x1d6   : > { %v1124_v34 = vpop.permute.xlu1 %1123  ;;  %1813 = vst.msk [vmem:[%s2940_s18] sm:$0xff] %vm502_vm1, %v1797_v32 }
 0x1d7   : > { %v1122_v35 = vpop.permute.xlu0 %1121  ;;  %1157 = vst.msk [vmem:[#allocation3 + $0x3c] sm:$0xf] %vm1141_vm9, %v1124_v34 }
 0x1d8   : > { %1156 = vst.msk [vmem:[#allocation3 + $0x38] sm:$0xf] %vm1141_vm9, %v1122_v35 }
 0x1d9   : > { %v1759_v36 = vpop.f32.mrf.mxu1  ;;  %1270 = vst.msk [vmem:[#allocation3 + $0x38] sm:$0xf] %vm1255_vm10, %v1236_v33 }
 0x1da   : > { %v1760_v37 = vadd.f32 %v2930_v23, %v1759_v36 }
 0x1dc   : > { %v1798_v39 = vadd.f32 %v2171_v38, %v1760_v37 }
 0x1de   : > { %v1349_v40 = vpop.permute.xlu1 %1348  ;;  %1814 = vst.msk [vmem:[%s2940_s18 + $0x8] sm:$0xff] %vm502_vm1, %v1798_v39 }
 0x1df   : > { %v1238_v41 = vpop.permute.xlu0 %1237  ;;  %1383 = vst.msk [vmem:[#allocation3 + $0x38] sm:$0xf] %vm1368_vm11, %v1349_v40 }
 0x1e0   : > { %1271 = vst.msk [vmem:[#allocation3 + $0x3c] sm:$0xf] %vm1255_vm10, %v1238_v41 }
 0x1e1   : > { %1384 = vst.msk [vmem:[#allocation3 + $0x3c] sm:$0xf] %vm1368_vm11, %v1351_v42  ;;  %v2178_v42 = vld [vmem:[%s2334_s17 + $0x40] sm:$0xff] }
 0x1e6   : > { %v1464_v43 = vpop.permute.xlu1 %1463 }
 0x1e7   : > { %v1462_v44 = vpop.permute.xlu0 %1461  ;;  %1497 = vst.msk [vmem:[#allocation3 + $0x3c] sm:$0xf] %vm1481_vm12, %v1464_v43 }
 0x1e8   : > { %1496 = vst.msk [vmem:[#allocation3 + $0x38] sm:$0xf] %vm1481_vm12, %v1462_v44 }
 0x1ed   : > { %v1636_v45 = vpop.f32.mrf.mxu0 }
 0x1ee   : > { %v1637_v47 = vadd.f32 %v2840_v55, %v1636_v45 }
 0x1ef   : > { %v2097_v46 = vld [vmem:[#allocation3 + $0x38] sm:$0xff] }
 0x1f0   : > { %2053 = vmatmul.msk.bf16.gmra.mxu3 %vm1578_vm13, %v2097_v46  ;;  %v1664_v50 = vmax.f32 %v1637_v47, 0.0  ;;  %v2179_v46 = vld [vmem:[%s2334_s17 + $0x48] sm:$0xff] }
 0x1f5   : > { %v1638_v48 = vpop.f32.mrf.mxu0 }
 0x1f6   : > { %v1639_v49 = vadd.f32 %v2840_v55, %v1638_v48 }
 0x1f8   : > { %v1665_v51 = vmax.f32 %v1639_v49, 0.0  ;;  %v2180_v49 = vld [vmem:[%s2334_s17 + $0x50] sm:$0xff] }
 0x1f9   : > { %v1762_v52 = vpop.f32.mrf.mxu1 }
 0x1fa   : > { %v1763_v53 = vadd.f32 %v2930_v23, %v1762_v52  ;;  %v1676_v54 = vpack.c.bf16 %v1665_v51, %v1664_v50 }
 0x1fc   : > { %v1799_v59 = vadd.f32 %v2172_v58, %v1763_v53  ;;  %1776 = vmatmul.bf16.vlgmr.msra.gmra.mxu2 %v1676_v54  ;;  %v2181_v53 = vld [vmem:[%s2334_s17 + $0x58] sm:$0xff] }
 0x1fe   : > { %1815 = vst.msk [vmem:[%s2940_s18 + $0x10] sm:$0xff] %vm502_vm1, %v1799_v59 }
 0x201   : > { %v1764_v60 = vpop.f32.mrf.mxu1 }
 0x202   : > { %v1765_v61 = vadd.f32 %v2930_v23, %v1764_v60 }
 0x204   : > { %v1800_v63 = vadd.f32 %v2173_v62, %v1765_v61 }
 0x206   : > { %1816 = vst.msk [vmem:[%s2940_s18 + $0x18] sm:$0xff] %vm502_vm1, %v1800_v63 }
 0x21c   : > { %v1641_v0 = vpop.f32.mrf.mxu3 }
 0x21d   : > { %v1642_v2 = vadd.f32 %v2840_v55, %v1641_v0 }
 0x21f   : > { %v1666_v3 = vmax.f32 %v1642_v2, 0.0 }
 0x222   : > { %v1767_v1 = vpop.f32.mrf.mxu1 }
 0x223   : > { %v1768_v57 = vadd.f32 %v2930_v23, %v1767_v1 }
 0x224   : > { %v1643_v4 = vpop.f32.mrf.mxu3 }
 0x225   : > { %v1801_v8 = vadd.f32 %v2174_v6, %v1768_v57  ;;  %v1644_v7 = vadd.f32 %v2840_v55, %v1643_v4 }
 0x227   : > { %1817 = vst.msk [vmem:[%s2940_s18 + $0x20] sm:$0xff] %vm502_vm1, %v1801_v8  ;;  %v1667_v9 = vmax.f32 %v1644_v7, 0.0 }
 0x229   : > { %v1677_v10 = vpack.c.bf16 %v1667_v9, %v1666_v3 }
 0x22a   : > { %v1769_v11 = vpop.f32.mrf.mxu1 }
 0x22b   : > { %v1770_v12 = vadd.f32 %v2930_v23, %v1769_v11  ;;  %1781 = vmatmul.bf16.gmra.mxu2 %v1677_v10 }
 0x22d   : > { %v1802_v14 = vadd.f32 %v2175_v13, %v1770_v12 }
 0x22f   : > { %1818 = vst.msk [vmem:[%s2940_s18 + $0x28] sm:$0xff] %vm502_vm1, %v1802_v14 }
 0x24b   : > { %v1646_v15 = vpop.f32.mrf.mxu3 }
 0x24c   : > { %v1647_v17 = vadd.f32 %v2840_v55, %v1646_v15 }
 0x24e   : > { %v1668_v24 = vmax.f32 %v1647_v17, 0.0 }
 0x251   : > { %v1772_v16 = vpop.f32.mrf.mxu1 }
 0x252   : > { %v1773_v18 = vadd.f32 %v2930_v23, %v1772_v16 }
 0x253   : > { %v1648_v19 = vpop.f32.mrf.mxu3 }
 0x254   : > { %v1803_v21 = vadd.f32 %v2176_v20, %v1773_v18  ;;  %v1649_v22 = vadd.f32 %v2840_v55, %v1648_v19 }
 0x256   : > { %1819 = vst.msk [vmem:[%s2940_s18 + $0x30] sm:$0xff] %vm502_vm1, %v1803_v21  ;;  %v1669_v25 = vmax.f32 %v1649_v22, 0.0 }
 0x258   : > { %v1678_v28 = vpack.c.bf16 %v1669_v25, %v1668_v24 }
 0x259   : > { %v1774_v29 = vpop.f32.mrf.mxu1 }
 0x25a   : > { %v1775_v30 = vadd.f32 %v2930_v23, %v1774_v29  ;;  %1786 = vmatmul.bf16.gmra.mxu2 %v1678_v28 }
 0x25c   : > { %v1804_v32 = vadd.f32 %v2177_v31, %v1775_v30 }
 0x25e   : > { %1820 = vst.msk [vmem:[%s2940_s18 + $0x38] sm:$0xff] %vm502_vm1, %v1804_v32 }
 0x273   : > { %v1651_v33 = vpop.f32.mrf.mxu3 }
 0x274   : > { %v1652_v34 = vadd.f32 %v2840_v55, %v1651_v33 }
 0x276   : > { %v1670_v37 = vmax.f32 %v1652_v34, 0.0 }
 0x27b   : > { %v1653_v35 = vpop.f32.mrf.mxu3 }
 0x27c   : > { %v1654_v36 = vadd.f32 %v2840_v55, %v1653_v35 }
 0x27e   : > { %v1671_v38 = vmax.f32 %v1654_v36, 0.0 }
 0x27f   : > { %v1777_v39 = vpop.f32.mrf.mxu2 }
 0x280   : > { %v1778_v40 = vadd.f32 %v2930_v23, %v1777_v39  ;;  %v1679_v41 = vpack.c.bf16 %v1671_v38, %v1670_v37 }
 0x282   : > { %v1805_v43 = vadd.f32 %v2178_v42, %v1778_v40  ;;  %1791 = vmatmul.bf16.gmra.mxu2 %v1679_v41 }
 0x284   : > { %1821 = vst.msk [vmem:[%s2940_s18 + $0x40] sm:$0xff] %vm502_vm1, %v1805_v43 }
 0x287   : > { %v1779_v44 = vpop.f32.mrf.mxu2 }
 0x288   : > { %v1780_v45 = vadd.f32 %v2930_v23, %v1779_v44 }
 0x28a   : > { %v1806_v55 = vadd.f32 %v2179_v46, %v1780_v45 }
 0x28c   : > { %1822 = vst.msk [vmem:[%s2940_s18 + $0x48] sm:$0xff] %vm502_vm1, %v1806_v55 }
 0x2ae   : > { %v1782_v47 = vpop.f32.mrf.mxu2 }
 0x2af   : > { %v1783_v48 = vadd.f32 %v2930_v23, %v1782_v47 }
 0x2b1   : > { %v1807_v50 = vadd.f32 %v2180_v49, %v1783_v48 }
 0x2b3   : > { %1823 = vst.msk [vmem:[%s2940_s18 + $0x50] sm:$0xff] %vm502_vm1, %v1807_v50 }
 0x2b6   : > { %v1784_v51 = vpop.f32.mrf.mxu2 }
 0x2b7   : > { %v1785_v52 = vadd.f32 %v2930_v23, %v1784_v51 }
 0x2b9   : > { %v1808_v54 = vadd.f32 %v2181_v53, %v1785_v52 }
 0x2bb   : > { %1824 = vst.msk [vmem:[%s2940_s18 + $0x58] sm:$0xff] %vm502_vm1, %v1808_v54 }
 0x2dd   : > { %v1787_v58 = vpop.f32.mrf.mxu2 }
 0x2de   : > { %v1788_v59 = vadd.f32 %v2930_v23, %v1787_v58 }
 0x2e0   : > { %v1809_v60 = vadd.f32 %v1788_v59, %v2646_v26 }
 0x2e2   : > { %1825 = vst.msk [vmem:[%s2940_s18 + $0x60] sm:$0xff] %vm502_vm1, %v1809_v60 }
 0x2e5   : > { %v1789_v61 = vpop.f32.mrf.mxu2 }
 0x2e6   : > { %v1790_v62 = vadd.f32 %v2930_v23, %v1789_v61 }
 0x2e8   : > { %v1810_v63 = vadd.f32 %v1790_v62, %v2649_v27 }
 0x2ea   : > { %1826 = vst.msk [vmem:[%s2940_s18 + $0x68] sm:$0xff] %vm502_vm1, %v1810_v63 }
 0x305   : > { %v1792_v0 = vpop.f32.mrf.mxu2 }
 0x306   : > { %v1793_v1 = vadd.f32 %v2930_v23, %v1792_v0 }
 0x308   : > { %v1811_v2 = vadd.f32 %v1793_v1, %v2715_v56 }
 0x30a   : > { %1827 = vst.msk [vmem:[%s2940_s18 + $0x70] sm:$0xff] %vm502_vm1, %v1811_v2 }
 0x30d   : > { %v1794_v57 = vpop.f32.mrf.mxu2 }
 0x30e   : > { %v1795_v4 = vadd.f32 %v2930_v23, %v1794_v57 }
 0x310   : > { %v1812_v26 = vadd.f32 %v1795_v4, %v2739_v5 }
 0x312   : > { %1828 = vst.msk [vmem:[%s2940_s18 + $0x78] sm:$0xff] %vm502_vm1, %v1812_v26 }
 0x313 PF: > { %s17_s28 = sadd.s32 1, %s2220_s28   ;;  %s3048_s24 = smov %s2212_s26 }
 0x314   : > { %p14_p12 = scmp.ge.s32.totalorder %s17_s28, 6   ;;  %s3049_s25 = smov %s2216_s27 }
 0x315   : > { %s3050_s26 = smov %s3053_s29  ;;  %s3051_s27 = smov %s3057_s30 }
 0x316   :  { %16 = sbr.rel (!%p14_p12) target bundleno = 3 (0x3), region = 87 }

</bundles_post_ra>
